<compile_context>
chip_gen: v6e
topology: v6e:2x2x1
jax: 0.10.0
libtpu: 0.0.40
codegen_flags: <defaults>
</compile_context>

<pallas_src>
import functools

import numpy as np
import jax
import jax.numpy as jnp
from jax.experimental import pallas as pl
from jax.experimental.pallas import tpu as pltpu


def _round_up(x, m):
    return ((x + m - 1) // m) * m


# ----------------------------------------------------------------------------
# Fused Pallas kernel: AttentionGate + concat + DoubleConv
# ----------------------------------------------------------------------------
def _up_fused_kernel(g_ref, x_ref, wgT_ref, wxT_ref, bgx_ref, wpsi_ref,
                     bpsi_ref, w1_ref, b1_ref, w2_ref, b2_ref, o_ref,
                     *, H, W, Wpad):
    """Channels on sublanes, flattened zero-padded spatial on lanes.

    g_ref : (Fg, Lpos)   upsampled gating signal, padded-flat, zero borders.
    x_ref : (Fl, Lpos)   skip connection, padded-flat, zero borders.
    o_ref : (Cout, M)    output; column j = h*Wpad + w -> pixel (h, w), w < W.

    Padded-flat layout: padded pixel (hp, wp) sits at column hp*Wpad + wp, so
    a 3x3 tap (dy, dx) of output column j is input column j + dy*Wpad + dx.
    """
    M = H * Wpad
    Lpos = g_ref.shape[-1]

    g = g_ref[...].astype(jnp.float32)          # (Fg, Lpos)
    x = x_ref[...].astype(jnp.float32)          # (Fl, Lpos)

    # --- Attention gate: 1x1 convs are channel matmuls (BN folded). ---------
    a = (jnp.dot(wgT_ref[...], g, preferred_element_type=jnp.float32) +
         jnp.dot(wxT_ref[...], x, preferred_element_type=jnp.float32) +
         bgx_ref[...])                           # (Fint, Lpos)
    a = jnp.maximum(a, 0.0)
    # Fint -> 1 projection: VPU multiply + cheap cross-sublane reduction.
    z = jnp.sum(a * wpsi_ref[...], axis=0, keepdims=True) + bpsi_ref[...]
    # Sigmoid.  (pl.reciprocal(..., approx=True) would push the divide onto
    # the EUP, but psi is only ~4 vregs; exact division keeps accuracy slack.)
    psi = pl.reciprocal(1.0 + jnp.exp(-z), approx=False)    # (1, Lpos)
    xg = x * psi          # gated skip; zero on borders because x is zero there

    # torch.cat([x2*psi, x1], dim=1) == sublane concat (Fl is 8-aligned here).
    xcat = jnp.concatenate([xg, g], axis=0)      # (Fl+Fg, Lpos)

    # Junk-column mask (w >= W), built once and reused by both convs.
    col = jax.lax.broadcasted_iota(jnp.int32, (1, M), 1) % Wpad
    keep = col < W

    def conv3x3(src, w9_ref, b_ref, mask):
        """3x3 SAME conv + bias + ReLU over a padded-flat (Cin, Lpos) image.

        One MXU dot per tap with the full channel depth as K; each tap slab is
        a static lane-slice (a handful of vregs in this layout).
        """
        cout = b_ref.shape[0]
        acc = jnp.zeros((cout, M), jnp.float32)
        for t in range(9):
            off = (t // 3) * Wpad + (t % 3)
            acc = acc + jnp.dot(w9_ref[t], src[:, off:off + M],
                                preferred_element_type=jnp.float32)
        acc = jnp.maximum(acc + b_ref[...], 0.0)
        return jnp.where(mask, acc, 0.0) if mask is not None else acc

    # conv1 (+folded BN + ReLU) over the never-materialized concat.
    y1 = conv3x3(xcat, w1_ref, b1_ref, keep)     # (Cmid, M)

    # Re-embed conv1's result into the padded-flat layout entirely in VMEM
    # (pixel (h, w) -> column (h+1)*Wpad + (w+1)).  The masked junk columns
    # double as the in-row zero padding, so only leading/trailing zeros are
    # appended -- no scratch buffer, no zero-then-overwrite store pass.
    cmid = y1.shape[0]
    y1p = jnp.concatenate(
        [jnp.zeros((cmid, Wpad + 1), jnp.float32), y1,
         jnp.zeros((cmid, Lpos - (Wpad + 1) - M), jnp.float32)], axis=1)

    # conv2 (+folded BN + ReLU); single lane-dense store to the output block.
    o_ref[...] = conv3x3(y1p, w2_ref, b2_ref, None).astype(o_ref.dtype)


# ----------------------------------------------------------------------------
# Wrappers
# ----------------------------------------------------------------------------
def _pad_flatten_nchw(x, Wpad, Lpos):
    """(B,C,H,W) -> zero-pad to (Hp, Wpad) -> flatten spatial -> (B,C,Lpos)."""
    B, C, H, W = x.shape
    xp = jnp.pad(x, ((0, 0), (0, 0), (1, 1), (1, Wpad - W - 1)))
    xf = xp.reshape(B, C, (H + 2) * Wpad)
    return jnp.pad(xf, ((0, 0), (0, 0), (0, Lpos - xf.shape[-1])))


def attention_double_conv(g_nchw, x_nchw, params, out_dtype=jnp.float32):
    """Fused AttentionGate + concat + DoubleConv in a single pallas_call."""
    B, Fg, H, W = g_nchw.shape
    Fl = x_nchw.shape[1]
    att = params["att"]
    Fint = att["wg"].shape[-1]
    Cout = params["conv1_w"].shape[-1]

    Wpad = _round_up(W + 2, 8)                       # padded row pitch
    M = H * Wpad                                     # output columns per image
    Lpos = _round_up((H + 2) * Wpad + 2, 128)        # flat length (+2 headroom)
    assert Lpos >= (H + 2) * Wpad + 2                # tap-slice headroom

    gf = _pad_flatten_nchw(g_nchw, Wpad, Lpos)       # (B, Fg, Lpos)
    xf = _pad_flatten_nchw(x_nchw, Wpad, Lpos)       # (B, Fl, Lpos)

    # Transposed weights so dots are (Cout, Cin) @ (Cin, L) with L on lanes.
    wgT = att["wg"].T                                # (Fint, Fg)
    wxT = att["wx"].T                                # (Fint, Fl)
    bgx = (att["bg"] + att["bx"]).reshape(Fint, 1)
    wpsi = att["wpsi"].reshape(Fint, 1)
    bpsi = att["bpsi"].reshape(1, 1)
    # conv1 input channels: [0, Fl) = gated skip, [Fl, Fl+Fg) = upsampled
    # (matches torch.cat([x2, x1], dim=1)); no concat tensor is ever built.
    w9_1 = params["conv1_w"].reshape(9, Fl + Fg, Cout).transpose(0, 2, 1)
    w9_2 = params["conv2_w"].reshape(9, Cout, Cout).transpose(0, 2, 1)
    b1 = params["conv1_b"].reshape(Cout, 1)
    b2 = params["conv2_b"].reshape(Cout, 1)

    kern = functools.partial(_up_fused_kernel, H=H, W=W, Wpad=Wpad)
    const2 = lambda i: (0, 0)
    const3 = lambda i: (0, 0, 0)

    out_flat = pl.pallas_call(
        kern,
        out_shape=jax.ShapeDtypeStruct((B, Cout, M), out_dtype),
        grid=(B,),
        in_specs=[
            pl.BlockSpec((None, Fg, Lpos), lambda i: (i, 0, 0)),
            pl.BlockSpec((None, Fl, Lpos), lambda i: (i, 0, 0)),
            pl.BlockSpec((Fint, Fg), const2),
            pl.BlockSpec((Fint, Fl), const2),
            pl.BlockSpec((Fint, 1), const2),
            pl.BlockSpec((Fint, 1), const2),
            pl.BlockSpec((1, 1), const2),
            pl.BlockSpec((9, Cout, Fl + Fg), const3),
            pl.BlockSpec((Cout, 1), const2),
            pl.BlockSpec((9, Cout, Cout), const3),
            pl.BlockSpec((Cout, 1), const2),
        ],
        out_specs=pl.BlockSpec((None, Cout, M), lambda i: (i, 0, 0)),
        compiler_params=pltpu.CompilerParams(
            dimension_semantics=("parallel",)),
    )(gf, xf, wgT, wxT, bgx, wpsi, bpsi, w9_1, b1, w9_2, b2)

    # Drop the junk columns (w in [W, Wpad)); output is already NCHW-native.
    return out_flat.reshape(B, Cout, H, Wpad)[:, :, :, :W]


def bilinear_upsample_x2(x):
    """2x bilinear upsample (align_corners=True, matches nn.Upsample), NCHW."""
    B, C, H, W = x.shape
    Ho, Wo = 2 * H, 2 * W
    ys = jnp.arange(Ho, dtype=jnp.float32) * ((H - 1) / max(Ho - 1, 1))
    xs = jnp.arange(Wo, dtype=jnp.float32) * ((W - 1) / max(Wo - 1, 1))
    iy0 = jnp.floor(ys).astype(jnp.int32)
    iy1 = jnp.minimum(iy0 + 1, H - 1)
    ix0 = jnp.floor(xs).astype(jnp.int32)
    ix1 = jnp.minimum(ix0 + 1, W - 1)
    wy = (ys - iy0.astype(jnp.float32))[None, None, :, None]
    wx = (xs - ix0.astype(jnp.float32))[None, None, None, :]
    r0, r1 = x[:, :, iy0, :], x[:, :, iy1, :]
    top = r0[:, :, :, ix0] * (1.0 - wx) + r0[:, :, :, ix1] * wx
    bot = r1[:, :, :, ix0] * (1.0 - wx) + r1[:, :, :, ix1] * wx
    return top * (1.0 - wy) + bot * wy


def up_forward(x1_nchw, x2_nchw, params):
    """Full `Up.forward` (inputs/outputs in PyTorch NCHW convention)."""
    x1 = bilinear_upsample_x2(x1_nchw)
    diffY = x2_nchw.shape[2] - x1.shape[2]
    diffX = x2_nchw.shape[3] - x1.shape[3]
    x1 = jnp.pad(x1, ((0, 0), (0, 0),
                      (diffY // 2, diffY - diffY // 2),
                      (diffX // 2, diffX - diffX // 2)))
    return attention_double_conv(x1, x2_nchw, params)


# ----------------------------------------------------------------------------
# Deterministic parameter construction (Conv + folded inference-mode BN)
# ----------------------------------------------------------------------------
def init_params(key, Fg, Fl, Fout):
    Fint = Fl // 2
    ks = jax.random.split(key, 15)

    def bn_params(k, c):
        k1, k2, k3, k4 = jax.random.split(k, 4)
        gamma = 1.0 + 0.1 * jax.random.normal(k1, (c,), jnp.float32)
        beta = 0.1 * jax.random.normal(k2, (c,), jnp.float32)
        mean = 0.1 * jax.random.normal(k3, (c,), jnp.float32)
        var = 0.5 + jax.random.uniform(k4, (c,), jnp.float32)
        return gamma, beta, mean, var

    def fold(w, b, bnp, eps=1e-5):
        gamma, beta, mean, var = bnp
        scale = gamma / jnp.sqrt(var + eps)            # per output channel
        return w * scale, (b - mean) * scale + beta

    def conv_bn(kw, kb, kbn, shape):                   # shape: (..., Cin, Cout)
        fan_in = int(np.prod(shape[:-1]))
        cout = shape[-1]
        w = jax.random.normal(kw, shape, jnp.float32) / np.sqrt(fan_in)
        b = 0.1 * jax.random.normal(kb, (cout,), jnp.float32)
        return fold(w, b, bn_params(kbn, cout))

    wg, bg = conv_bn(ks[0], ks[1], ks[2], (Fg, Fint))
    wx, bx = conv_bn(ks[3], ks[4], ks[5], (Fl, Fint))
    wpsi, bpsi = conv_bn(ks[6], ks[7], ks[8], (Fint, 1))
    c1w, c1b = conv_bn(ks[9], ks[10], ks[11], (3, 3, Fl + Fg, Fout))
    c2w, c2b = conv_bn(ks[12], ks[13], ks[14], (3, 3, Fout, Fout))

    return {
        "att": {"wg": wg, "bg": bg, "wx": wx, "bx": bx,
                "wpsi": wpsi, "bpsi": bpsi},
        "conv1_w": c1w, "conv1_b": c1b,
        "conv2_w": c2w, "conv2_b": c2b,
    }


# ----------------------------------------------------------------------------
# Pure-JAX reference (independent code path) for the correctness check
# ----------------------------------------------------------------------------
def reference_forward(x1_nchw, x2_nchw, p):
    hp = jax.lax.Precision.HIGHEST
    x1 = bilinear_upsample_x2(x1_nchw)
    diffY = x2_nchw.shape[2] - x1.shape[2]
    diffX = x2_nchw.shape[3] - x1.shape[3]
    x1 = jnp.pad(x1, ((0, 0), (0, 0),
                      (diffY // 2, diffY - diffY // 2),
                      (diffX // 2, diffX - diffX // 2)))
    x1 = jnp.transpose(x1, (0, 2, 3, 1))               # NHWC
    x2 = jnp.transpose(x2_nchw, (0, 2, 3, 1))
    a = p["att"]
    g1 = jnp.einsum("bhwc,cf->bhwf", x1, a["wg"], precision=hp) + a["bg"]
    xx = jnp.einsum("bhwc,cf->bhwf", x2, a["wx"], precision=hp) + a["bx"]
    psi = jnp.maximum(g1 + xx, 0.0)
    psi = jnp.einsum("bhwc,cf->bhwf", psi, a["wpsi"], precision=hp) + a["bpsi"]
    psi = 1.0 / (1.0 + jnp.exp(-psi))
    x2a = x2 * psi
    x = jnp.concatenate([x2a, x1], axis=-1)

    def conv(x, w, b):
        y = jax.lax.conv_general_dilated(
            x, w, (1, 1), "SAME",
            dimension_numbers=("NHWC", "HWIO", "NHWC"), precision=hp) + b
        return jnp.maximum(y, 0.0)

    y = conv(x, p["conv1_w"], p["conv1_b"])
    y = conv(y, p["conv2_w"], p["conv2_b"])
    return jnp.transpose(y, (0, 3, 1, 2))


# ----------------------------------------------------------------------------
if __name__ == "__main__":
    key = jax.random.PRNGKey(0)
    k1, k2, k3 = jax.random.split(key, 3)

    # Up(in_channels=6, skip_channels=8, out_channels=12, bilinear=True)
    B, Cg, Cl, Cout = 2, 6, 8, 12
    H1, W1 = 8, 8          # low-res feature map (gets upsampled x2)
    H2, W2 = 16, 16        # skip-connection spatial size

    x1 = jax.random.normal(k1, (B, Cg, H1, W1), jnp.float32)   # NCHW (PyTorch)
    x2 = jax.random.normal(k2, (B, Cl, H2, W2), jnp.float32)
    params = init_params(k3, Cg, Cl, Cout)

    fwd = jax.jit(up_forward)
    out = jax.block_until_ready(fwd(x1, x2, params))
    ref = jax.block_until_ready(reference_forward(x1, x2, params))

    assert out.shape == (B, Cout, H2, W2), out.shape
    if not np.allclose(np.asarray(out), np.asarray(ref), rtol=2e-3, atol=2e-3):
        raise AssertionError("Pallas output does not match reference")

    print("KERNEL_OK")
</pallas_src>

<mosaic_0001>
module attributes {stable_mosaic.version = 11 : i64} {
  func.func @_up_fused_kernel(%arg0: i32, %arg1: memref<1x6x512xf32, #tpu.memory_space<vmem>>, %arg2: memref<1x8x512xf32, #tpu.memory_space<vmem>>, %arg3: memref<4x6xf32, #tpu.memory_space<vmem>>, %arg4: memref<4x8xf32, #tpu.memory_space<vmem>>, %arg5: memref<4x1xf32, #tpu.memory_space<vmem>>, %arg6: memref<4x1xf32, #tpu.memory_space<vmem>>, %arg7: memref<1x1xf32, #tpu.memory_space<vmem>>, %arg8: memref<9x12x14xf32, #tpu.memory_space<vmem>>, %arg9: memref<12x1xf32, #tpu.memory_space<vmem>>, %arg10: memref<9x12x12xf32, #tpu.memory_space<vmem>>, %arg11: memref<12x1xf32, #tpu.memory_space<vmem>>, %arg12: memref<1x12x384xf32, #tpu.memory_space<vmem>>) attributes {dimension_semantics = [#tpu.dimension_semantics<parallel>], iteration_bounds = array<i64: 2>, scalar_prefetch = 0 : i64, scratch_operands = 0 : i64, tpu.core_type = #tpu.core_type<tc>, window_params = [{transform_indices = @transform_0, window_bounds = array<i64: 1, 6, 512>}, {transform_indices = @transform_1, window_bounds = array<i64: 1, 8, 512>}, {pipeline_mode = #tpu.pipeline_mode<synchronous>, transform_indices = @transform_2, window_bounds = array<i64: 4, 6>}, {pipeline_mode = #tpu.pipeline_mode<synchronous>, transform_indices = @transform_3, window_bounds = array<i64: 4, 8>}, {pipeline_mode = #tpu.pipeline_mode<synchronous>, transform_indices = @transform_4, window_bounds = array<i64: 4, 1>}, {pipeline_mode = #tpu.pipeline_mode<synchronous>, transform_indices = @transform_5, window_bounds = array<i64: 4, 1>}, {pipeline_mode = #tpu.pipeline_mode<synchronous>, transform_indices = @transform_6, window_bounds = array<i64: 1, 1>}, {pipeline_mode = #tpu.pipeline_mode<synchronous>, transform_indices = @transform_7, window_bounds = array<i64: 9, 12, 14>}, {pipeline_mode = #tpu.pipeline_mode<synchronous>, transform_indices = @transform_8, window_bounds = array<i64: 12, 1>}, {pipeline_mode = #tpu.pipeline_mode<synchronous>, transform_indices = @transform_9, window_bounds = array<i64: 9, 12, 12>}, {pipeline_mode = #tpu.pipeline_mode<synchronous>, transform_indices = @transform_10, window_bounds = array<i64: 12, 1>}, {transform_indices = @transform_11, window_bounds = array<i64: 1, 12, 384>}]} {
    %c0 = arith.constant 0 : index
    %c0_0 = arith.constant 0 : index
    %c0_1 = arith.constant 0 : index
    %0 = vector.load %arg1[%c0, %c0_0, %c0_1] : memref<1x6x512xf32, #tpu.memory_space<vmem>>, vector<1x6x512xf32>
    %1 = vector.shape_cast %0 : vector<1x6x512xf32> to vector<6x512xf32>
    %c0_2 = arith.constant 0 : index
    %c0_3 = arith.constant 0 : index
    %c0_4 = arith.constant 0 : index
    %2 = vector.load %arg2[%c0_2, %c0_3, %c0_4] : memref<1x8x512xf32, #tpu.memory_space<vmem>>, vector<1x8x512xf32>
    %3 = vector.shape_cast %2 : vector<1x8x512xf32> to vector<8x512xf32>
    %c0_5 = arith.constant 0 : index
    %c0_6 = arith.constant 0 : index
    %4 = vector.load %arg3[%c0_5, %c0_6] : memref<4x6xf32, #tpu.memory_space<vmem>>, vector<4x6xf32>
    %cst = arith.constant dense<0.000000e+00> : vector<4x512xf32>
    %5 = tpu.matmul %4, %1, %cst {dimension_numbers = #tpu.dot_dimension_numbers<[1], [0], [0], [1], [0, 0, 1, 1], [], []>} : vector<4x6xf32>, vector<6x512xf32>, vector<4x512xf32> -> vector<4x512xf32>
    %c0_7 = arith.constant 0 : index
    %c0_8 = arith.constant 0 : index
    %6 = vector.load %arg4[%c0_7, %c0_8] : memref<4x8xf32, #tpu.memory_space<vmem>>, vector<4x8xf32>
    %cst_9 = arith.constant dense<0.000000e+00> : vector<4x512xf32>
    %7 = tpu.matmul %6, %3, %cst_9 {dimension_numbers = #tpu.dot_dimension_numbers<[1], [0], [0], [1], [0, 0, 1, 1], [], []>} : vector<4x8xf32>, vector<8x512xf32>, vector<4x512xf32> -> vector<4x512xf32>
    %8 = arith.addf %5, %7 : vector<4x512xf32>
    %c0_10 = arith.constant 0 : index
    %c0_11 = arith.constant 0 : index
    %9 = vector.load %arg5[%c0_10, %c0_11] : memref<4x1xf32, #tpu.memory_space<vmem>>, vector<4x1xf32>
    %10 = vector.broadcast %9 : vector<4x1xf32> to vector<4x512xf32>
    %11 = arith.addf %8, %10 : vector<4x512xf32>
    %cst_12 = arith.constant 0.000000e+00 : f32
    %12 = vector.broadcast %cst_12 : f32 to vector<4x512xf32>
    %13 = arith.maximumf %11, %12 : vector<4x512xf32>
    %c0_13 = arith.constant 0 : index
    %c0_14 = arith.constant 0 : index
    %14 = vector.load %arg6[%c0_13, %c0_14] : memref<4x1xf32, #tpu.memory_space<vmem>>, vector<4x1xf32>
    %15 = vector.broadcast %14 : vector<4x1xf32> to vector<4x512xf32>
    %16 = arith.mulf %13, %15 : vector<4x512xf32>
    %cst_15 = arith.constant dense<0.000000e+00> : vector<512xf32>
    %17 = vector.multi_reduction <add>, %16, %cst_15 [0] : vector<4x512xf32> to vector<512xf32>
    %18 = vector.shape_cast %17 : vector<512xf32> to vector<1x512xf32>
    %c0_16 = arith.constant 0 : index
    %c0_17 = arith.constant 0 : index
    %19 = vector.load %arg7[%c0_16, %c0_17] : memref<1x1xf32, #tpu.memory_space<vmem>>, vector<1x1xf32>
    %20 = vector.broadcast %19 : vector<1x1xf32> to vector<1x512xf32>
    %21 = arith.addf %18, %20 : vector<1x512xf32>
    %cst_18 = arith.constant 0.000000e+00 : f32
    %22 = vector.broadcast %cst_18 : f32 to vector<1x512xf32>
    %23 = arith.subf %22, %21 : vector<1x512xf32>
    %24 = math.exp %23 : vector<1x512xf32>
    %cst_19 = arith.constant 1.000000e+00 : f32
    %25 = vector.broadcast %cst_19 : f32 to vector<1x512xf32>
    %26 = arith.addf %25, %24 : vector<1x512xf32>
    %27 = tpu.reciprocal %26 : vector<1x512xf32> -> vector<1x512xf32>
    %28 = vector.broadcast %27 : vector<1x512xf32> to vector<8x512xf32>
    %29 = arith.mulf %3, %28 : vector<8x512xf32>
    %30 = tpu.concatenate %29, %1 in 0 : vector<8x512xf32>, vector<6x512xf32> -> vector<14x512xf32>
    %31 = tpu.iota {dimensions = array<i32: 1>} : vector<1x384xi32>
    %c24_i32 = arith.constant 24 : i32
    %c0_i32 = arith.constant 0 : i32
    %32 = arith.cmpi eq, %c24_i32, %c0_i32 : i32
    %c1_i32 = arith.constant 1 : i32
    %33 = arith.select %32, %c1_i32, %c24_i32 : i32
    %34 = vector.broadcast %33 : i32 to vector<1x384xi32>
    %35 = arith.remsi %31, %34 : vector<1x384xi32>
    %c0_i32_20 = arith.constant 0 : i32
    %36 = vector.broadcast %c0_i32_20 : i32 to vector<1x384xi32>
    %37 = arith.cmpi ne, %35, %36 : vector<1x384xi32>
    %c0_i32_21 = arith.constant 0 : i32
    %38 = vector.broadcast %c0_i32_21 : i32 to vector<1x384xi32>
    %39 = arith.cmpi slt, %35, %38 : vector<1x384xi32>
    %c0_i32_22 = arith.constant 0 : i32
    %40 = arith.cmpi slt, %33, %c0_i32_22 : i32
    %41 = vector.broadcast %40 : i1 to vector<1x384xi1>
    %42 = vector.broadcast %41 : vector<1x384xi1> to vector<1x384xi1>
    %43 = arith.xori %39, %42 : vector<1x384xi1>
    %44 = arith.andi %43, %37 : vector<1x384xi1>
    %45 = vector.broadcast %33 : i32 to vector<1x384xi32>
    %46 = arith.addi %35, %45 : vector<1x384xi32>
    %47 = arith.select %44, %46, %35 : vector<1x384xi1>, vector<1x384xi32>
    %c16_i32 = arith.constant 16 : i32
    %48 = vector.broadcast %c16_i32 : i32 to vector<1x384xi32>
    %49 = arith.cmpi slt, %47, %48 : vector<1x384xi32>
    %cst_23 = arith.constant 0.000000e+00 : f32
    %50 = vector.broadcast %cst_23 : f32 to vector<12x384xf32>
    %c0_24 = arith.constant 0 : index
    %c0_25 = arith.constant 0 : index
    %c0_26 = arith.constant 0 : index
    %51 = vector.load %arg8[%c0_24, %c0_25, %c0_26] : memref<9x12x14xf32, #tpu.memory_space<vmem>>, vector<1x12x14xf32>
    %52 = vector.shape_cast %51 : vector<1x12x14xf32> to vector<12x14xf32>
    %53 = vector.extract_strided_slice %30 {offsets = [0, 0], sizes = [14, 384], strides = [1, 1]} : vector<14x512xf32> to vector<14x384xf32>
    %cst_27 = arith.constant dense<0.000000e+00> : vector<12x384xf32>
    %54 = tpu.matmul %52, %53, %cst_27 {dimension_numbers = #tpu.dot_dimension_numbers<[1], [0], [0], [1], [0, 0, 1, 1], [], []>} : vector<12x14xf32>, vector<14x384xf32>, vector<12x384xf32> -> vector<12x384xf32>
    %55 = arith.addf %50, %54 : vector<12x384xf32>
    %c1 = arith.constant 1 : index
    %c0_28 = arith.constant 0 : index
    %c0_29 = arith.constant 0 : index
    %56 = vector.load %arg8[%c1, %c0_28, %c0_29] : memref<9x12x14xf32, #tpu.memory_space<vmem>>, vector<1x12x14xf32>
    %57 = vector.shape_cast %56 : vector<1x12x14xf32> to vector<12x14xf32>
    %58 = vector.extract_strided_slice %30 {offsets = [0, 1], sizes = [14, 384], strides = [1, 1]} : vector<14x512xf32> to vector<14x384xf32>
    %cst_30 = arith.constant dense<0.000000e+00> : vector<12x384xf32>
    %59 = tpu.matmul %57, %58, %cst_30 {dimension_numbers = #tpu.dot_dimension_numbers<[1], [0], [0], [1], [0, 0, 1, 1], [], []>} : vector<12x14xf32>, vector<14x384xf32>, vector<12x384xf32> -> vector<12x384xf32>
    %60 = arith.addf %55, %59 : vector<12x384xf32>
    %c2 = arith.constant 2 : index
    %c0_31 = arith.constant 0 : index
    %c0_32 = arith.constant 0 : index
    %61 = vector.load %arg8[%c2, %c0_31, %c0_32] : memref<9x12x14xf32, #tpu.memory_space<vmem>>, vector<1x12x14xf32>
    %62 = vector.shape_cast %61 : vector<1x12x14xf32> to vector<12x14xf32>
    %63 = vector.extract_strided_slice %30 {offsets = [0, 2], sizes = [14, 384], strides = [1, 1]} : vector<14x512xf32> to vector<14x384xf32>
    %cst_33 = arith.constant dense<0.000000e+00> : vector<12x384xf32>
    %64 = tpu.matmul %62, %63, %cst_33 {dimension_numbers = #tpu.dot_dimension_numbers<[1], [0], [0], [1], [0, 0, 1, 1], [], []>} : vector<12x14xf32>, vector<14x384xf32>, vector<12x384xf32> -> vector<12x384xf32>
    %65 = arith.addf %60, %64 : vector<12x384xf32>
    %c3 = arith.constant 3 : index
    %c0_34 = arith.constant 0 : index
    %c0_35 = arith.constant 0 : index
    %66 = vector.load %arg8[%c3, %c0_34, %c0_35] : memref<9x12x14xf32, #tpu.memory_space<vmem>>, vector<1x12x14xf32>
    %67 = vector.shape_cast %66 : vector<1x12x14xf32> to vector<12x14xf32>
    %68 = vector.extract_strided_slice %30 {offsets = [0, 24], sizes = [14, 384], strides = [1, 1]} : vector<14x512xf32> to vector<14x384xf32>
    %cst_36 = arith.constant dense<0.000000e+00> : vector<12x384xf32>
    %69 = tpu.matmul %67, %68, %cst_36 {dimension_numbers = #tpu.dot_dimension_numbers<[1], [0], [0], [1], [0, 0, 1, 1], [], []>} : vector<12x14xf32>, vector<14x384xf32>, vector<12x384xf32> -> vector<12x384xf32>
    %70 = arith.addf %65, %69 : vector<12x384xf32>
    %c4 = arith.constant 4 : index
    %c0_37 = arith.constant 0 : index
    %c0_38 = arith.constant 0 : index
    %71 = vector.load %arg8[%c4, %c0_37, %c0_38] : memref<9x12x14xf32, #tpu.memory_space<vmem>>, vector<1x12x14xf32>
    %72 = vector.shape_cast %71 : vector<1x12x14xf32> to vector<12x14xf32>
    %73 = vector.extract_strided_slice %30 {offsets = [0, 25], sizes = [14, 384], strides = [1, 1]} : vector<14x512xf32> to vector<14x384xf32>
    %cst_39 = arith.constant dense<0.000000e+00> : vector<12x384xf32>
    %74 = tpu.matmul %72, %73, %cst_39 {dimension_numbers = #tpu.dot_dimension_numbers<[1], [0], [0], [1], [0, 0, 1, 1], [], []>} : vector<12x14xf32>, vector<14x384xf32>, vector<12x384xf32> -> vector<12x384xf32>
    %75 = arith.addf %70, %74 : vector<12x384xf32>
    %c5 = arith.constant 5 : index
    %c0_40 = arith.constant 0 : index
    %c0_41 = arith.constant 0 : index
    %76 = vector.load %arg8[%c5, %c0_40, %c0_41] : memref<9x12x14xf32, #tpu.memory_space<vmem>>, vector<1x12x14xf32>
    %77 = vector.shape_cast %76 : vector<1x12x14xf32> to vector<12x14xf32>
    %78 = vector.extract_strided_slice %30 {offsets = [0, 26], sizes = [14, 384], strides = [1, 1]} : vector<14x512xf32> to vector<14x384xf32>
    %cst_42 = arith.constant dense<0.000000e+00> : vector<12x384xf32>
    %79 = tpu.matmul %77, %78, %cst_42 {dimension_numbers = #tpu.dot_dimension_numbers<[1], [0], [0], [1], [0, 0, 1, 1], [], []>} : vector<12x14xf32>, vector<14x384xf32>, vector<12x384xf32> -> vector<12x384xf32>
    %80 = arith.addf %75, %79 : vector<12x384xf32>
    %c6 = arith.constant 6 : index
    %c0_43 = arith.constant 0 : index
    %c0_44 = arith.constant 0 : index
    %81 = vector.load %arg8[%c6, %c0_43, %c0_44] : memref<9x12x14xf32, #tpu.memory_space<vmem>>, vector<1x12x14xf32>
    %82 = vector.shape_cast %81 : vector<1x12x14xf32> to vector<12x14xf32>
    %83 = vector.extract_strided_slice %30 {offsets = [0, 48], sizes = [14, 384], strides = [1, 1]} : vector<14x512xf32> to vector<14x384xf32>
    %cst_45 = arith.constant dense<0.000000e+00> : vector<12x384xf32>
    %84 = tpu.matmul %82, %83, %cst_45 {dimension_numbers = #tpu.dot_dimension_numbers<[1], [0], [0], [1], [0, 0, 1, 1], [], []>} : vector<12x14xf32>, vector<14x384xf32>, vector<12x384xf32> -> vector<12x384xf32>
    %85 = arith.addf %80, %84 : vector<12x384xf32>
    %c7 = arith.constant 7 : index
    %c0_46 = arith.constant 0 : index
    %c0_47 = arith.constant 0 : index
    %86 = vector.load %arg8[%c7, %c0_46, %c0_47] : memref<9x12x14xf32, #tpu.memory_space<vmem>>, vector<1x12x14xf32>
    %87 = vector.shape_cast %86 : vector<1x12x14xf32> to vector<12x14xf32>
    %88 = vector.extract_strided_slice %30 {offsets = [0, 49], sizes = [14, 384], strides = [1, 1]} : vector<14x512xf32> to vector<14x384xf32>
    %cst_48 = arith.constant dense<0.000000e+00> : vector<12x384xf32>
    %89 = tpu.matmul %87, %88, %cst_48 {dimension_numbers = #tpu.dot_dimension_numbers<[1], [0], [0], [1], [0, 0, 1, 1], [], []>} : vector<12x14xf32>, vector<14x384xf32>, vector<12x384xf32> -> vector<12x384xf32>
    %90 = arith.addf %85, %89 : vector<12x384xf32>
    %c8 = arith.constant 8 : index
    %c0_49 = arith.constant 0 : index
    %c0_50 = arith.constant 0 : index
    %91 = vector.load %arg8[%c8, %c0_49, %c0_50] : memref<9x12x14xf32, #tpu.memory_space<vmem>>, vector<1x12x14xf32>
    %92 = vector.shape_cast %91 : vector<1x12x14xf32> to vector<12x14xf32>
    %93 = vector.extract_strided_slice %30 {offsets = [0, 50], sizes = [14, 384], strides = [1, 1]} : vector<14x512xf32> to vector<14x384xf32>
    %cst_51 = arith.constant dense<0.000000e+00> : vector<12x384xf32>
    %94 = tpu.matmul %92, %93, %cst_51 {dimension_numbers = #tpu.dot_dimension_numbers<[1], [0], [0], [1], [0, 0, 1, 1], [], []>} : vector<12x14xf32>, vector<14x384xf32>, vector<12x384xf32> -> vector<12x384xf32>
    %95 = arith.addf %90, %94 : vector<12x384xf32>
    %c0_52 = arith.constant 0 : index
    %c0_53 = arith.constant 0 : index
    %96 = vector.load %arg9[%c0_52, %c0_53] : memref<12x1xf32, #tpu.memory_space<vmem>>, vector<12x1xf32>
    %97 = vector.broadcast %96 : vector<12x1xf32> to vector<12x384xf32>
    %98 = arith.addf %95, %97 : vector<12x384xf32>
    %cst_54 = arith.constant 0.000000e+00 : f32
    %99 = vector.broadcast %cst_54 : f32 to vector<12x384xf32>
    %100 = arith.maximumf %98, %99 : vector<12x384xf32>
    %cst_55 = arith.constant 0.000000e+00 : f32
    %101 = vector.shape_cast %49 : vector<1x384xi1> to vector<1x384xi1>
    %102 = vector.broadcast %101 : vector<1x384xi1> to vector<12x384xi1>
    %103 = vector.broadcast %cst_55 : f32 to vector<12x384xf32>
    %104 = arith.select %102, %100, %103 : vector<12x384xi1>, vector<12x384xf32>
    %cst_56 = arith.constant 0.000000e+00 : f32
    %105 = vector.broadcast %cst_56 : f32 to vector<12x25xf32>
    %cst_57 = arith.constant 0.000000e+00 : f32
    %106 = vector.broadcast %cst_57 : f32 to vector<12x103xf32>
    %107 = tpu.concatenate %105, %104, %106 in 1 : vector<12x25xf32>, vector<12x384xf32>, vector<12x103xf32> -> vector<12x512xf32>
    %cst_58 = arith.constant 0.000000e+00 : f32
    %108 = vector.broadcast %cst_58 : f32 to vector<12x384xf32>
    %c0_59 = arith.constant 0 : index
    %c0_60 = arith.constant 0 : index
    %c0_61 = arith.constant 0 : index
    %109 = vector.load %arg10[%c0_59, %c0_60, %c0_61] : memref<9x12x12xf32, #tpu.memory_space<vmem>>, vector<1x12x12xf32>
    %110 = vector.shape_cast %109 : vector<1x12x12xf32> to vector<12x12xf32>
    %111 = vector.extract_strided_slice %107 {offsets = [0, 0], sizes = [12, 384], strides = [1, 1]} : vector<12x512xf32> to vector<12x384xf32>
    %cst_62 = arith.constant dense<0.000000e+00> : vector<12x384xf32>
    %112 = tpu.matmul %110, %111, %cst_62 {dimension_numbers = #tpu.dot_dimension_numbers<[1], [0], [0], [1], [0, 0, 1, 1], [], []>} : vector<12x12xf32>, vector<12x384xf32>, vector<12x384xf32> -> vector<12x384xf32>
    %113 = arith.addf %108, %112 : vector<12x384xf32>
    %c1_63 = arith.constant 1 : index
    %c0_64 = arith.constant 0 : index
    %c0_65 = arith.constant 0 : index
    %114 = vector.load %arg10[%c1_63, %c0_64, %c0_65] : memref<9x12x12xf32, #tpu.memory_space<vmem>>, vector<1x12x12xf32>
    %115 = vector.shape_cast %114 : vector<1x12x12xf32> to vector<12x12xf32>
    %116 = vector.extract_strided_slice %107 {offsets = [0, 1], sizes = [12, 384], strides = [1, 1]} : vector<12x512xf32> to vector<12x384xf32>
    %cst_66 = arith.constant dense<0.000000e+00> : vector<12x384xf32>
    %117 = tpu.matmul %115, %116, %cst_66 {dimension_numbers = #tpu.dot_dimension_numbers<[1], [0], [0], [1], [0, 0, 1, 1], [], []>} : vector<12x12xf32>, vector<12x384xf32>, vector<12x384xf32> -> vector<12x384xf32>
    %118 = arith.addf %113, %117 : vector<12x384xf32>
    %c2_67 = arith.constant 2 : index
    %c0_68 = arith.constant 0 : index
    %c0_69 = arith.constant 0 : index
    %119 = vector.load %arg10[%c2_67, %c0_68, %c0_69] : memref<9x12x12xf32, #tpu.memory_space<vmem>>, vector<1x12x12xf32>
    %120 = vector.shape_cast %119 : vector<1x12x12xf32> to vector<12x12xf32>
    %121 = vector.extract_strided_slice %107 {offsets = [0, 2], sizes = [12, 384], strides = [1, 1]} : vector<12x512xf32> to vector<12x384xf32>
    %cst_70 = arith.constant dense<0.000000e+00> : vector<12x384xf32>
    %122 = tpu.matmul %120, %121, %cst_70 {dimension_numbers = #tpu.dot_dimension_numbers<[1], [0], [0], [1], [0, 0, 1, 1], [], []>} : vector<12x12xf32>, vector<12x384xf32>, vector<12x384xf32> -> vector<12x384xf32>
    %123 = arith.addf %118, %122 : vector<12x384xf32>
    %c3_71 = arith.constant 3 : index
    %c0_72 = arith.constant 0 : index
    %c0_73 = arith.constant 0 : index
    %124 = vector.load %arg10[%c3_71, %c0_72, %c0_73] : memref<9x12x12xf32, #tpu.memory_space<vmem>>, vector<1x12x12xf32>
    %125 = vector.shape_cast %124 : vector<1x12x12xf32> to vector<12x12xf32>
    %126 = vector.extract_strided_slice %107 {offsets = [0, 24], sizes = [12, 384], strides = [1, 1]} : vector<12x512xf32> to vector<12x384xf32>
    %cst_74 = arith.constant dense<0.000000e+00> : vector<12x384xf32>
    %127 = tpu.matmul %125, %126, %cst_74 {dimension_numbers = #tpu.dot_dimension_numbers<[1], [0], [0], [1], [0, 0, 1, 1], [], []>} : vector<12x12xf32>, vector<12x384xf32>, vector<12x384xf32> -> vector<12x384xf32>
    %128 = arith.addf %123, %127 : vector<12x384xf32>
    %c4_75 = arith.constant 4 : index
    %c0_76 = arith.constant 0 : index
    %c0_77 = arith.constant 0 : index
    %129 = vector.load %arg10[%c4_75, %c0_76, %c0_77] : memref<9x12x12xf32, #tpu.memory_space<vmem>>, vector<1x12x12xf32>
    %130 = vector.shape_cast %129 : vector<1x12x12xf32> to vector<12x12xf32>
    %131 = vector.extract_strided_slice %107 {offsets = [0, 25], sizes = [12, 384], strides = [1, 1]} : vector<12x512xf32> to vector<12x384xf32>
    %cst_78 = arith.constant dense<0.000000e+00> : vector<12x384xf32>
    %132 = tpu.matmul %130, %131, %cst_78 {dimension_numbers = #tpu.dot_dimension_numbers<[1], [0], [0], [1], [0, 0, 1, 1], [], []>} : vector<12x12xf32>, vector<12x384xf32>, vector<12x384xf32> -> vector<12x384xf32>
    %133 = arith.addf %128, %132 : vector<12x384xf32>
    %c5_79 = arith.constant 5 : index
    %c0_80 = arith.constant 0 : index
    %c0_81 = arith.constant 0 : index
    %134 = vector.load %arg10[%c5_79, %c0_80, %c0_81] : memref<9x12x12xf32, #tpu.memory_space<vmem>>, vector<1x12x12xf32>
    %135 = vector.shape_cast %134 : vector<1x12x12xf32> to vector<12x12xf32>
    %136 = vector.extract_strided_slice %107 {offsets = [0, 26], sizes = [12, 384], strides = [1, 1]} : vector<12x512xf32> to vector<12x384xf32>
    %cst_82 = arith.constant dense<0.000000e+00> : vector<12x384xf32>
    %137 = tpu.matmul %135, %136, %cst_82 {dimension_numbers = #tpu.dot_dimension_numbers<[1], [0], [0], [1], [0, 0, 1, 1], [], []>} : vector<12x12xf32>, vector<12x384xf32>, vector<12x384xf32> -> vector<12x384xf32>
    %138 = arith.addf %133, %137 : vector<12x384xf32>
    %c6_83 = arith.constant 6 : index
    %c0_84 = arith.constant 0 : index
    %c0_85 = arith.constant 0 : index
    %139 = vector.load %arg10[%c6_83, %c0_84, %c0_85] : memref<9x12x12xf32, #tpu.memory_space<vmem>>, vector<1x12x12xf32>
    %140 = vector.shape_cast %139 : vector<1x12x12xf32> to vector<12x12xf32>
    %141 = vector.extract_strided_slice %107 {offsets = [0, 48], sizes = [12, 384], strides = [1, 1]} : vector<12x512xf32> to vector<12x384xf32>
    %cst_86 = arith.constant dense<0.000000e+00> : vector<12x384xf32>
    %142 = tpu.matmul %140, %141, %cst_86 {dimension_numbers = #tpu.dot_dimension_numbers<[1], [0], [0], [1], [0, 0, 1, 1], [], []>} : vector<12x12xf32>, vector<12x384xf32>, vector<12x384xf32> -> vector<12x384xf32>
    %143 = arith.addf %138, %142 : vector<12x384xf32>
    %c7_87 = arith.constant 7 : index
    %c0_88 = arith.constant 0 : index
    %c0_89 = arith.constant 0 : index
    %144 = vector.load %arg10[%c7_87, %c0_88, %c0_89] : memref<9x12x12xf32, #tpu.memory_space<vmem>>, vector<1x12x12xf32>
    %145 = vector.shape_cast %144 : vector<1x12x12xf32> to vector<12x12xf32>
    %146 = vector.extract_strided_slice %107 {offsets = [0, 49], sizes = [12, 384], strides = [1, 1]} : vector<12x512xf32> to vector<12x384xf32>
    %cst_90 = arith.constant dense<0.000000e+00> : vector<12x384xf32>
    %147 = tpu.matmul %145, %146, %cst_90 {dimension_numbers = #tpu.dot_dimension_numbers<[1], [0], [0], [1], [0, 0, 1, 1], [], []>} : vector<12x12xf32>, vector<12x384xf32>, vector<12x384xf32> -> vector<12x384xf32>
    %148 = arith.addf %143, %147 : vector<12x384xf32>
    %c8_91 = arith.constant 8 : index
    %c0_92 = arith.constant 0 : index
    %c0_93 = arith.constant 0 : index
    %149 = vector.load %arg10[%c8_91, %c0_92, %c0_93] : memref<9x12x12xf32, #tpu.memory_space<vmem>>, vector<1x12x12xf32>
    %150 = vector.shape_cast %149 : vector<1x12x12xf32> to vector<12x12xf32>
    %151 = vector.extract_strided_slice %107 {offsets = [0, 50], sizes = [12, 384], strides = [1, 1]} : vector<12x512xf32> to vector<12x384xf32>
    %cst_94 = arith.constant dense<0.000000e+00> : vector<12x384xf32>
    %152 = tpu.matmul %150, %151, %cst_94 {dimension_numbers = #tpu.dot_dimension_numbers<[1], [0], [0], [1], [0, 0, 1, 1], [], []>} : vector<12x12xf32>, vector<12x384xf32>, vector<12x384xf32> -> vector<12x384xf32>
    %153 = arith.addf %148, %152 : vector<12x384xf32>
    %c0_95 = arith.constant 0 : index
    %c0_96 = arith.constant 0 : index
    %154 = vector.load %arg11[%c0_95, %c0_96] : memref<12x1xf32, #tpu.memory_space<vmem>>, vector<12x1xf32>
    %155 = vector.broadcast %154 : vector<12x1xf32> to vector<12x384xf32>
    %156 = arith.addf %153, %155 : vector<12x384xf32>
    %cst_97 = arith.constant 0.000000e+00 : f32
    %157 = vector.broadcast %cst_97 : f32 to vector<12x384xf32>
    %158 = arith.maximumf %156, %157 : vector<12x384xf32>
    %c0_98 = arith.constant 0 : index
    %c0_99 = arith.constant 0 : index
    %c0_100 = arith.constant 0 : index
    %159 = vector.load %arg12[%c0_98, %c0_99, %c0_100] : memref<1x12x384xf32, #tpu.memory_space<vmem>>, vector<1x12x384xf32>
    %160 = vector.shape_cast %159 : vector<1x12x384xf32> to vector<12x384xf32>
    %161 = vector.shape_cast %158 : vector<12x384xf32> to vector<1x12x384xf32>
    tpu.vector_store %arg12[%c0_98, %c0_99, %c0_100], %161 {strides = array<i32>} : memref<1x12x384xf32, #tpu.memory_space<vmem>>, vector<1x12x384xf32>,
    return
  }
  func.func @transform_0(%arg0: i32) -> (i32, i32, i32) {
    %c0_i32 = arith.constant 0 : i32
    %c0_i32_0 = arith.constant 0 : i32
    %c0_i32_1 = arith.constant 0 : i32
    return %arg0, %c0_i32, %c0_i32_0 : i32, i32, i32
  }
  func.func @transform_1(%arg0: i32) -> (i32, i32, i32) {
    %c0_i32 = arith.constant 0 : i32
    %c0_i32_0 = arith.constant 0 : i32
    %c0_i32_1 = arith.constant 0 : i32
    return %arg0, %c0_i32, %c0_i32_0 : i32, i32, i32
  }
  func.func @transform_2(%arg0: i32) -> (i32, i32) {
    %c0_i32 = arith.constant 0 : i32
    %c0_i32_0 = arith.constant 0 : i32
    %c0_i32_1 = arith.constant 0 : i32
    return %c0_i32, %c0_i32_0 : i32, i32
  }
  func.func @transform_3(%arg0: i32) -> (i32, i32) {
    %c0_i32 = arith.constant 0 : i32
    %c0_i32_0 = arith.constant 0 : i32
    %c0_i32_1 = arith.constant 0 : i32
    return %c0_i32, %c0_i32_0 : i32, i32
  }
  func.func @transform_4(%arg0: i32) -> (i32, i32) {
    %c0_i32 = arith.constant 0 : i32
    %c0_i32_0 = arith.constant 0 : i32
    %c0_i32_1 = arith.constant 0 : i32
    return %c0_i32, %c0_i32_0 : i32, i32
  }
  func.func @transform_5(%arg0: i32) -> (i32, i32) {
    %c0_i32 = arith.constant 0 : i32
    %c0_i32_0 = arith.constant 0 : i32
    %c0_i32_1 = arith.constant 0 : i32
    return %c0_i32, %c0_i32_0 : i32, i32
  }
  func.func @transform_6(%arg0: i32) -> (i32, i32) {
    %c0_i32 = arith.constant 0 : i32
    %c0_i32_0 = arith.constant 0 : i32
    %c0_i32_1 = arith.constant 0 : i32
    return %c0_i32, %c0_i32_0 : i32, i32
  }
  func.func @transform_7(%arg0: i32) -> (i32, i32, i32) {
    %c0_i32 = arith.constant 0 : i32
    %c0_i32_0 = arith.constant 0 : i32
    %c0_i32_1 = arith.constant 0 : i32
    %c0_i32_2 = arith.constant 0 : i32
    return %c0_i32, %c0_i32_0, %c0_i32_1 : i32, i32, i32
  }
  func.func @transform_8(%arg0: i32) -> (i32, i32) {
    %c0_i32 = arith.constant 0 : i32
    %c0_i32_0 = arith.constant 0 : i32
    %c0_i32_1 = arith.constant 0 : i32
    return %c0_i32, %c0_i32_0 : i32, i32
  }
  func.func @transform_9(%arg0: i32) -> (i32, i32, i32) {
    %c0_i32 = arith.constant 0 : i32
    %c0_i32_0 = arith.constant 0 : i32
    %c0_i32_1 = arith.constant 0 : i32
    %c0_i32_2 = arith.constant 0 : i32
    return %c0_i32, %c0_i32_0, %c0_i32_1 : i32, i32, i32
  }
  func.func @transform_10(%arg0: i32) -> (i32, i32) {
    %c0_i32 = arith.constant 0 : i32
    %c0_i32_0 = arith.constant 0 : i32
    %c0_i32_1 = arith.constant 0 : i32
    return %c0_i32, %c0_i32_0 : i32, i32
  }
  func.func @transform_11(%arg0: i32) -> (i32, i32, i32) {
    %c0_i32 = arith.constant 0 : i32
    %c0_i32_0 = arith.constant 0 : i32
    %c0_i32_1 = arith.constant 0 : i32
    return %arg0, %c0_i32, %c0_i32_0 : i32, i32, i32
  }
}

</mosaic_0001>

<bundles_post_ra>
// kernel: up_forward.1
= control target key start
LH: loop header
LB: loop body
LE: loop exit
PB: predicated region body
PF: predicated region fallthrough
CT: control target
= control target key end

     0   :  { %s5042_s19 = smov 0   ;;  %s6162_s0 = inlined_call_operand.vmem [shape: f32[2,6,512], index: 0, kind: input, shape index: {}]   ;;  %s6163_s1 = inlined_call_operand.vmem [shape: f32[2,8,512], index: 1, kind: input, shape index: {}]   ;;  %s6164_s2 = inlined_call_operand.vmem [shape: f32[4,6], index: 2, kind: input, shape index: {}]   ;;  %s6165_s3 = inlined_call_operand.vmem [shape: f32[4,8], index: 3, kind: input, shape index: {}]   ;;  %s6166_s4 = inlined_call_operand.vmem [shape: f32[4,1], index: 4, kind: input, shape index: {}]   ;;  %s6167_s5 = inlined_call_operand.vmem [shape: f32[4,1], index: 5, kind: input, shape index: {}]   ;;  %s6168_s6 = inlined_call_operand.<no memory space> [shape: f32[1,1], index: 6, kind: input, shape index: {}]   ;;  %s6169_s7 = inlined_call_operand.vmem [shape: f32[9,12,14], index: 7, kind: input, shape index: {}]   ;;  %s6170_s8 = inlined_call_operand.vmem [shape: f32[12,1], index: 8, kind: input, shape index: {}]   ;;  %s6171_s9 = inlined_call_operand.vmem [shape: f32[9,12,12], index: 9, kind: input, shape index: {}]   ;;  %s6172_s10 = inlined_call_operand.vmem [shape: f32[12,1], index: 10, kind: input, shape index: {}]   ;;  %s6173_s11 = inlined_call_operand.vmem [shape: f32[2,12,384], index: 11, kind: output, shape index: {}]  }
   0x1   :  { %v16_v0 = vstv %s6168_s6 }
   0x2   :  { %17 = vst [vmem:[#allocation2] sm:$0x1] %v16_v0 }
   0x3 LB: > { %s4536_s20 = sadd.s32 4294967295, %s4966_s19   ;;  %p4540_p0 = scmp.ge.s32.totalorder %s4966_s19, 1  ;;  %s4966_s19 = sphi %s5042_s19, %s23_s19  }
   0x4   : > { %p349_p1 = scmp.lt.s32.totalorder %s4966_s19, 3 }
   0x6   : > { %p350_p2 = pnand %p4540_p0, %p349_p1 }
   0x7   : > { %p394_p3 = scmp.lt.s32.totalorder (!%p350_p2), %s4536_s20, 1  ;;  %s4970_s14 = smov (!%p350_p2), 127  }
   0x8   : > { %353 = sbr.rel (%p350_p2) target bundleno = 1250 (0x4e2), region = 64  ;;  %s4971_s17 = smov (!%p350_p2), 126  }
   0x9   : > { %s4972_s18 = smov (!%p350_p2), 104   ;;  %s4973_s6 = smov (!%p350_p2), 103  }
   0xa   : > { %s4974_s21 = smov (!%p350_p2), 102   ;;  %s4976_s23 = smov (!%p350_p2), 79  }
   0xb   : > { %s4977_s26 = smov (!%p350_p2), 78   ;;  %s4978_s24 = smov (!%p350_p2), 25  }
   0xd   : > { %v4968_v1 = vmov 0.0   ;;  %v724_v2 = vld [vmem:[%s6166_s4] sm:$0xf]  ;;  %s6183_s20 = smov (!%p394_p3, %s4536_s20), 1  ;;  %v4969_v3 = vmov 0   ;;  %vm419_vm0 = vcmask 64512   ;;  %v783_v35 = vlaneseq }
   0xe   : > { %487 = vmatprep.mubr.f32.mxu0 %v4968_v1  ;;  %558 = vmatprep.mubr.f32.mxu1 %v4968_v1  ;;  %v777_v4 = vld [vmem:[#allocation2] sm:$0x1]  ;;  %s4716_s22 = sshll.u32 %s6183_s20, 5  ;;  %vm569_vm1 = vcmask 1045504   ;;  %vm565_vm2 = vcmask 48128   ;;  %vm895_vm3 = vcmask 1039360  }
   0xf   : > { %4942 = vset.pattern.permute.xlu0 %v4969_v3  ;;  %4943 = vset.pattern.permute.xlu1 %v4969_v3  ;;  %v738_v5 = vld [vmem:[%s6167_s5] sm:$0xf]  ;;  %s398_s27 = scalar_lea.vmem %s6162_s0, %s4716_s22  ;;  %s403_s30 = scalar_lea.vmem %s6163_s1, %s4716_s22  ;;  %vm748_vm4 = vcmask 1043456   ;;  %v784_v47 = vshrl.u32 %v783_v35, 7  ;;  %vm905_vm5 = vcmask 113664   ;;  %vm1247_vm6 = vcmask 1031168  }
  0x10   : > { %727 = vperm.xlu0 %4942, %v724_v2   ;;  %780 = vperm.xlu1 %4943, %v777_v4   ;;  %v5067_v6 = vld [vmem:[%s398_s27 + $0x8] sm:$0x3f]  ;;  %v5071_v8 = vld [vmem:[%s403_s30 + $0x18] sm:$0xff]  ;;  %v418_v9 = vld [vmem:[%s6165_s3] sm:$0xf]  ;;  %s4975_s22 = smov 80  }
  0x11   : > { %v5069_v7 = vld [vmem:[%s403_s30 + $0x8] sm:$0xff]  ;;  %v5078_v10 = vld [vmem:[%s398_s27 + $0x18] sm:$0x3f]  ;;  %524 = vmatprep.subr.mxu1 %v5071_v8  ;;  %v5082_v11 = vld [vmem:[%s403_s30] sm:$0xff]  ;;  %v785_v61 = vsub.s32 0, %v784_v47  ;;  %vm1446_vm7 = vcmask 850944  }
  0x12   : > { %453 = vmatprep.subr.mxu0 %v5069_v7  ;;  %v5084_v12 = vld [vmem:[%s403_s30 + $0x10] sm:$0xff]  ;;  %v5086_v13 = vld [vmem:[%s398_s27] sm:$0x3f]  ;;  %vm1645_vm8 = vcmask 842752   ;;  %vm1844_vm9 = vcmask 834560   ;;  %vm2043_vm10 = vcmask 654336  }
  0x13   : > { %454 = vmatpush1.msra.mxu0 %v5082_v11  ;;  %525 = vmatpush1.msra.mxu1 %v5084_v12  ;;  %v5090_v14 = vld [vmem:[%s398_s27 + $0x10] sm:$0x3f]  ;;  %v417_v15 = vld [vmem:[%s6164_s2] sm:$0xf]  ;;  %vm2242_vm11 = vcmask 646144   ;;  %vm2441_vm12 = vcmask 637952  }
  0x14   : > { %741 = vperm.xlu0 %4942, %v738_v5   ;;  %889 = vrot.lane.b32.xlu1 %v5067_v6, %s4970_s14 }
  0x15   : > { %4546 = vmatmul.mubr.msk.f32.vlgmr.msra.gmra.mxu0 %vm419_vm0, %v418_v9  ;;  %4547 = vmatmul.mubr.msk.f32.vlgmr.msra.gmra.mxu1 %vm419_vm0, %v418_v9 }
  0x16   : > { %4548 = vmatprep.subr.msk.mxu0 %vm569_vm1, %v5067_v6  ;;  %4551 = vmatprep.subr.msk.mxu1 %vm569_vm1, %v5078_v10 }
  0x17   : > { %4549 = vmatpush1.msk.msra.mxu0 %vm569_vm1, %v5086_v13  ;;  %646 = vmatprep.mubr.f32.mxu0 %v4968_v1 }
  0x18   : > { %4552 = vmatpush1.msk.msra.mxu1 %vm569_vm1, %v5090_v14  ;;  %717 = vmatprep.mubr.f32.mxu1 %v4968_v1 }
  0x19   : > { %4550 = vmatmul.mubr.msk.f32.vlgmr.msra.gmra.mxu0 %vm565_vm2, %v417_v15  ;;  %4553 = vmatmul.mubr.msk.f32.vlgmr.msra.gmra.mxu1 %vm565_vm2, %v417_v15 }
  0x1a   : > { %887 = vrot.lane.b32.xlu1 %v5086_v13, %s4970_s14  ;;  %891 = vrot.lane.b32.xlu0 %v5090_v14, %s4970_s14 }
  0x1b   : > { %982 = vmatprep.mubr.f32.mxu0 %v4968_v1 }
  0x1e   : > { %893 = vrot.lane.b32.xlu1 %v5078_v10, %s4970_s14  ;;  %1243 = vrot.lane.b32.xlu0 %v5090_v14, %s4971_s17 }
  0x22   : > { %1241 = vrot.lane.b32.xlu1 %v5067_v6, %s4971_s17  ;;  %1444 = vrot.lane.b32.xlu0 %v5078_v10, %s4972_s18 }
  0x26   : > { %1239 = vrot.lane.b32.xlu1 %v5086_v13, %s4971_s17  ;;  %1438 = vrot.lane.b32.xlu0 %v5086_v13, %s4972_s18 }
  0x2a   : > { %1245 = vrot.lane.b32.xlu1 %v5078_v10, %s4971_s17  ;;  %1639 = vrot.lane.b32.xlu0 %v5067_v6, %s4973_s6 }
  0x2e   : > { %1442 = vrot.lane.b32.xlu1 %v5090_v14, %s4972_s18  ;;  %1842 = vrot.lane.b32.xlu0 %v5078_v10, %s4974_s21 }
  0x32   : > { %1440 = vrot.lane.b32.xlu1 %v5067_v6, %s4972_s18  ;;  %1836 = vrot.lane.b32.xlu0 %v5086_v13, %s4974_s21 }
  0x36   : > { %1641 = vrot.lane.b32.xlu1 %v5090_v14, %s4973_s6  ;;  %2037 = vrot.lane.b32.xlu0 %v5067_v6, %s4975_s22 }
  0x3a   : > { %1637 = vrot.lane.b32.xlu1 %v5086_v13, %s4973_s6  ;;  %2240 = vrot.lane.b32.xlu0 %v5078_v10, %s4976_s23 }
  0x3e   : > { %1643 = vrot.lane.b32.xlu1 %v5078_v10, %s4973_s6 }
  0x42   : > { %1840 = vrot.lane.b32.xlu1 %v5090_v14, %s4974_s21 }
  0x46   : > { %1838 = vrot.lane.b32.xlu1 %v5067_v6, %s4974_s21 }
  0x4a   : > { %2039 = vrot.lane.b32.xlu1 %v5090_v14, %s4975_s22 }
  0x4e   : > { %2035 = vrot.lane.b32.xlu1 %v5086_v13, %s4975_s22 }
  0x52   : > { %2041 = vrot.lane.b32.xlu1 %v5078_v10, %s4975_s22 }
  0x56   : > { %2238 = vrot.lane.b32.xlu1 %v5090_v14, %s4976_s23 }
  0x8b   : > { %v781_v16 = vpop.permute.xlu1 %780  ;;  %v728_v17 = vpop.permute.xlu0 %727 }
  0x8c   : > { %v786_v5 = vrot.slane %v781_v16, %v785_v61 }
  0x8f   : > { %v890_v18 = vpop.permute.xlu1 %889  ;;  %v742_v27 = vpop.permute.xlu0 %741 }
  0x93   : > { %v888_v28 = vpop.permute.xlu1 %887  ;;  %v892_v40 = vpop.permute.xlu0 %891 }
  0x94   : > { %v899_v41 = vsel %vm895_vm3, %v888_v28, %v890_v18  ;;  %v900_v48 = vsel %vm895_vm3, %v890_v18, %v892_v40 }
  0x95   : > { %4556 = vmatprep.subr.msk.mxu0 %vm569_vm1, %v900_v48 }
  0x96   : > { %4557 = vmatpush1.msk.msra.mxu0 %vm569_vm1, %v899_v41 }
  0x97   : > { %v894_v46 = vpop.permute.xlu1 %893 }
  0x98   : > { %v901_v49 = vsel %vm895_vm3, %v892_v40, %v894_v46 }
  0x99   : > { %4790 = vmatprep.subr.msk.mxu1 %vm569_vm1, %v901_v49 }
  0x9a   : > { %4791 = vmatpush3.msk.msra.mxu1 %vm569_vm1, %v901_v49 }
  0xd5   : > { %v489_v19 = vpop.f32.mrf.mxu0  ;;  %v560_v20 = vpop.f32.mrf.mxu1 }
  0xd7   : > { %v491_v21 = vpop.f32.mrf.mxu0  ;;  %v562_v22 = vpop.f32.mrf.mxu1 }
  0xd9   : > { %v719_v23 = vpop.f32.mrf.mxu1  ;;  %v648_v24 = vpop.f32.mrf.mxu0 }
  0xda   : > { %v720_v25 = vadd.f32 %v719_v23, %v560_v20  ;;  %v649_v26 = vadd.f32 %v648_v24, %v489_v19 }
  0xdb   : > { %v650_v29 = vpop.f32.mrf.mxu0  ;;  %v721_v30 = vpop.f32.mrf.mxu1 }
  0xdc   : > { %v732_v31 = vadd.f32 %v728_v17, %v720_v25  ;;  %v730_v32 = vadd.f32 %v728_v17, %v649_v26  ;;  %v651_v33 = vadd.f32 %v650_v29, %v491_v21  ;;  %v722_v34 = vadd.f32 %v721_v30, %v562_v22 }
  0xde   : > { %v736_v36 = vmax.f32 %v732_v31, 0.0  ;;  %v734_v37 = vmax.f32 %v730_v32, 0.0  ;;  %v731_v38 = vadd.f32 %v728_v17, %v651_v33  ;;  %v733_v39 = vadd.f32 %v728_v17, %v722_v34 }
  0xe0   : > { %v744_v42 = vmul.f32 %v742_v27, %v734_v37  ;;  %v746_v43 = vmul.f32 %v742_v27, %v736_v36  ;;  %v735_v44 = vmax.f32 %v731_v38, 0.0  ;;  %v737_v45 = vmax.f32 %v733_v39, 0.0 }
  0xe2   : > { %v749_v50 = vsel %vm748_vm4, %v744_v42, 0.0  ;;  %v763_v51 = vsel %vm748_vm4, %v746_v43, 0.0  ;;  %v745_v52 = vmul.f32 %v742_v27, %v735_v44  ;;  %v747_v53 = vmul.f32 %v742_v27, %v737_v45 }
  0xe3   : > { %v750_v54 = vrot.slane %v749_v50, 4  ;;  %v764_v55 = vrot.slane %v763_v51, 4 }
  0xe4   : > { %v756_v56 = vsel %vm748_vm4, %v745_v52, 0.0  ;;  %v770_v57 = vsel %vm748_vm4, %v747_v53, 0.0 }
  0xe5   : > { %v751_v58 = vadd.f32 %v750_v54, %v749_v50  ;;  %v765_v59 = vadd.f32 %v764_v55, %v763_v51  ;;  %v757_v60 = vrot.slane %v756_v56, 4  ;;  %v771_v2 = vrot.slane %v770_v57, 4  ;;  %v5216_v55 = vpop.permute.xlu1 %1241 }
  0xe7   : > { %v752_v62 = vrot.slane %v751_v58, 2  ;;  %v766_v63 = vrot.slane %v765_v59, 2  ;;  %v758_v0 = vadd.f32 %v757_v60, %v756_v56  ;;  %v772_v15 = vadd.f32 %v771_v2, %v770_v57  ;;  %v5259_v60 = vpop.permute.xlu0 %1243 }
  0xe9   : > { %v753_v3 = vadd.f32 %v752_v62, %v751_v58  ;;  %v767_v4 = vadd.f32 %v766_v63, %v765_v59  ;;  %v759_v9 = vrot.slane %v758_v0, 2  ;;  %v773_v22 = vrot.slane %v772_v15, 2  ;;  %v2622_v58 = vld [vmem:[%s6170_s8 + $0x8] sm:$0xf] }
  0xeb   : > { %v754_v17 = vrot.slane %v753_v3, 1  ;;  %v768_v18 = vrot.slane %v767_v4, 1  ;;  %v760_v21 = vadd.f32 %v759_v9, %v758_v0  ;;  %v774_v28 = vadd.f32 %v773_v22, %v772_v15 }
  0xed   : > { %v755_v19 = vadd.f32 %v754_v17, %v753_v3  ;;  %v769_v20 = vadd.f32 %v768_v18, %v767_v4  ;;  %v761_v27 = vrot.slane %v760_v21, 1  ;;  %v775_v31 = vrot.slane %v774_v28, 1  ;;  %v2621_v4 = vld [vmem:[%s6170_s8] sm:$0xff] }
  0xef   : > { %v787_v23 = vadd.f32 %v786_v5, %v755_v19  ;;  %v789_v24 = vadd.f32 %v786_v5, %v769_v20  ;;  %v762_v16 = vadd.f32 %v761_v27, %v760_v21  ;;  %v776_v32 = vadd.f32 %v775_v31, %v774_v28 }
  0xf1   : > { %v791_v25 = vsub.f32 0.0, %v787_v23  ;;  %v793_v26 = vsub.f32 0.0, %v789_v24  ;;  %v788_v33 = vadd.f32 %v786_v5, %v762_v16  ;;  %v790_v34 = vadd.f32 %v786_v5, %v776_v32 }
  0xf3   : > { %v795_v29 = vmul.f32 1.442695, %v791_v25  ;;  %v799_v30 = vmul.f32 1.442695, %v793_v26  ;;  %v792_v36 = vsub.f32 0.0, %v788_v33  ;;  %v794_v39 = vsub.f32 0.0, %v790_v34 }
  0xf5   : > { %4944 = vpow2.f32 %v795_v29  ;;  %v797_v40 = vmul.f32 1.442695, %v792_v36  ;;  %v801_v43 = vmul.f32 1.442695, %v794_v39  ;;  %v4555_v39 = vld [vmem:[%s6169_s7 + $0x18] sm:$0xf] }
  0xf6   : > { %4946 = vpow2.f32 %v799_v30 }
 0x102   : > { %v4945_v37 = vpop.eup %4944 }
 0x103   : > { %v4947_v38 = vpop.eup %4946  ;;  %v803_v41 = vadd.f32 1.0, %v4945_v37 }
 0x104   : > { %v805_v42 = vadd.f32 1.0, %v4947_v38 }
 0x105   : > { %4948 = vrcp.f32 %v803_v41  ;;  %v870_v41 = vld [vmem:[%s6169_s7] sm:$0xff] }
 0x106   : > { %4950 = vrcp.f32 %v805_v42  ;;  %v871_v42 = vld [vmem:[%s6169_s7 + $0x8] sm:$0xf] }
 0x107   : > { %4952 = vpow2.f32 %v797_v40 }
 0x108   : > { %4954 = vpow2.f32 %v801_v43 }
 0x112   : > { %v4949_v44 = vpop.eup %4948 }
 0x113   : > { %v4951_v45 = vpop.eup %4950  ;;  %v5169_v46 = vmul.f32 %v4949_v44, %v5082_v11 }
 0x114   : > { %v4953_v47 = vpop.eup %4952  ;;  %v5172_v48 = vmul.f32 %v4951_v45, %v5084_v12  ;;  %v5193_v12 = vld [vmem:[%s6169_s7 + $0x10] sm:$0xff] }
 0x115   : > { %879 = vrot.lane.b32.xlu0 %v5169_v46, %s4970_s14  ;;  %v804_v49 = vadd.f32 1.0, %v4953_v47  ;;  %v4955_v50 = vpop.eup %4954  ;;  %4794 = vmatprep.mubr.msk.f32.mxu1 %vm905_vm5, %v5193_v12 }
 0x116   : > { %883 = vrot.lane.b32.xlu1 %v5172_v48, %s4970_s14  ;;  %v806_v11 = vadd.f32 1.0, %v4955_v50 }
 0x117   : > { %4956 = vrcp.f32 %v804_v49  ;;  %v4570_v49 = vld [vmem:[%s6169_s7 + $0x20] sm:$0xff] }
 0x118   : > { %4958 = vrcp.f32 %v806_v11 }
 0x119   : > { %1231 = vrot.lane.b32.xlu0 %v5169_v46, %s4971_s17 }
 0x11a   : > { %1235 = vrot.lane.b32.xlu1 %v5172_v48, %s4971_s17 }
 0x11d   : > { %1430 = vrot.lane.b32.xlu0 %v5169_v46, %s4972_s18 }
 0x11e   : > { %1434 = vrot.lane.b32.xlu1 %v5172_v48, %s4972_s18 }
 0x121   : > { %1629 = vrot.lane.b32.xlu0 %v5169_v46, %s4973_s6 }
 0x122   : > { %1633 = vrot.lane.b32.xlu1 %v5172_v48, %s4973_s6 }
 0x124   : > { %v4957_v51 = vpop.eup %4956 }
 0x125   : > { %1828 = vrot.lane.b32.xlu0 %v5169_v46, %s4974_s21  ;;  %v5206_v52 = vmul.f32 %v4957_v51, %v5069_v7  ;;  %v4959_v53 = vpop.eup %4958  ;;  %v5225_v7 = vpop.permute.xlu1 %1239 }
 0x126   : > { %1832 = vrot.lane.b32.xlu1 %v5172_v48, %s4974_s21  ;;  %v814_v54 = vmul.f32 %v4959_v53, %v5071_v8 }
 0x129   : > { %2027 = vrot.lane.b32.xlu0 %v5169_v46, %s4975_s22  ;;  %v5230_v8 = vpop.permute.xlu1 %1245 }
 0x12a   : > { %2031 = vrot.lane.b32.xlu1 %v5172_v48, %s4975_s22 }
 0x12d   : > { %881 = vrot.lane.b32.xlu0 %v5206_v52, %s4970_s14  ;;  %v5240_v56 = vpop.permute.xlu1 %1442 }
 0x12e   : > { %1432 = vrot.lane.b32.xlu1 %v5206_v52, %s4972_s18 }
 0x131   : > { %885 = vrot.lane.b32.xlu0 %v814_v54, %s4970_s14  ;;  %v5246_v57 = vpop.permute.xlu1 %1440 }
 0x132   : > { %2230 = vrot.lane.b32.xlu1 %v5172_v48, %s4976_s23 }
 0x135   : > { %1233 = vrot.lane.b32.xlu0 %v5206_v52, %s4971_s17  ;;  %v5255_v59 = vpop.permute.xlu1 %1641 }
 0x136   : > { %2236 = vrot.lane.b32.xlu1 %v5067_v6, %s4976_s23 }
 0x139   : > { %1237 = vrot.lane.b32.xlu0 %v814_v54, %s4971_s17  ;;  %v5261_v61 = vpop.permute.xlu1 %1637 }
 0x13a   : > { %1830 = vrot.lane.b32.xlu1 %v5206_v52, %s4974_s21 }
 0x13d   : > { %1436 = vrot.lane.b32.xlu0 %v814_v54, %s4972_s18  ;;  %v5268_v62 = vpop.permute.xlu1 %1643 }
 0x13e   : > { %2437 = vrot.lane.b32.xlu1 %v5090_v14, %s4977_s26 }
 0x141   : > { %2234 = vrot.lane.b32.xlu0 %v5086_v13, %s4976_s23  ;;  %v5273_v0 = vpop.permute.xlu1 %1840 }
 0x142   : > { %2433 = vrot.lane.b32.xlu1 %v5086_v13, %s4977_s26 }
 0x145   : > { %2435 = vrot.lane.b32.xlu0 %v5067_v6, %s4977_s26  ;;  %v5281_v3 = vpop.permute.xlu1 %1838 }
 0x146   : > { %2228 = vrot.lane.b32.xlu1 %v5206_v52, %s4976_s23 }
 0x149   : > { %1631 = vrot.lane.b32.xlu0 %v5206_v52, %s4973_s6  ;;  %v5289_v9 = vpop.permute.xlu1 %2039 }
 0x14a   : > { %2429 = vrot.lane.b32.xlu1 %v5172_v48, %s4977_s26 }
 0x14d   : > { %1635 = vrot.lane.b32.xlu0 %v814_v54, %s4973_s6  ;;  %v5293_v17 = vpop.permute.xlu1 %2035 }
 0x14e   : > { %2439 = vrot.lane.b32.xlu1 %v5078_v10, %s4977_s26  ;;  %v5266_v10 = vpop.permute.xlu0 %1444 }
 0x14f   : > { %v1452_v11 = vsel %vm1446_vm7, %v5240_v56, %v5266_v10  ;;  %v1651_v10 = vsel %vm1645_vm8, %v5255_v59, %v5268_v62 }
 0x151   : > { %1834 = vrot.lane.b32.xlu0 %v814_v54, %s4974_s21  ;;  %v5297_v19 = vpop.permute.xlu1 %2041 }
 0x152   : > { %2630 = vperm.xlu1 %4943, %v2622_v58   ;;  %v5271_v63 = vpop.permute.xlu0 %1438  ;;  %v4580_v58 = vld [vmem:[%s6169_s7 + $0x38] sm:$0xf] }
 0x155   : > { %2226 = vrot.lane.b32.xlu0 %v5169_v46, %s4976_s23  ;;  %v5301_v21 = vpop.permute.xlu1 %2238 }
 0x156   : > { %v5279_v2 = vpop.permute.xlu0 %1639 }
 0x159   : > { %2029 = vrot.lane.b32.xlu0 %v5206_v52, %s4975_s22 }
 0x15a   : > { %v5287_v5 = vpop.permute.xlu0 %1842 }
 0x15d   : > { %2033 = vrot.lane.b32.xlu0 %v814_v54, %s4975_s22 }
 0x15e   : > { %v5291_v15 = vpop.permute.xlu0 %1836 }
 0x161   : > { %2232 = vrot.lane.b32.xlu0 %v814_v54, %s4976_s23 }
 0x162   : > { %v5295_v18 = vpop.permute.xlu0 %2037 }
 0x165   : > { %2427 = vrot.lane.b32.xlu0 %v5206_v52, %s4977_s26 }
 0x166   : > { %v5299_v20 = vpop.permute.xlu0 %2240 }
 0x169   : > { %2425 = vrot.lane.b32.xlu0 %v5169_v46, %s4977_s26 }
 0x16d   : > { %2431 = vrot.lane.b32.xlu0 %v814_v54, %s4977_s26  ;;  %v1450_v54 = vsel %vm1446_vm7, %v5271_v63, %v5246_v57  ;;  %v1649_v63 = vsel %vm1645_vm8, %v5261_v61, %v5279_v2  ;;  %v4588_v61 = vld [vmem:[%s6169_s7 + $0x40] sm:$0xff] }
 0x171   : > { %2625 = vperm.xlu0 %4942, %v2621_v4  }
 0x187   : > { %v880_v22 = vpop.permute.xlu0 %879 }
 0x188   : > { %v884_v23 = vpop.permute.xlu1 %883 }
 0x18b   : > { %v1232_v24 = vpop.permute.xlu0 %1231 }
 0x18c   : > { %v1236_v25 = vpop.permute.xlu1 %1235 }
 0x18f   : > { %v5303_v26 = vpop.permute.xlu0 %1430 }
 0x190   : > { %v5305_v27 = vpop.permute.xlu1 %1434 }
 0x193   : > { %v5307_v28 = vpop.permute.xlu0 %1629 }
 0x194   : > { %v5309_v29 = vpop.permute.xlu1 %1633 }
 0x197   : > { %v5311_v30 = vpop.permute.xlu0 %1828 }
 0x198   : > { %v5315_v16 = vpop.permute.xlu1 %1832 }
 0x19b   : > { %v5313_v31 = vpop.permute.xlu0 %2027 }
 0x19c   : > { %v5319_v36 = vpop.permute.xlu1 %2031 }
 0x19f   : > { %v882_v32 = vpop.permute.xlu0 %881 }
 0x1a0   : > { %v897_v33 = vsel %vm895_vm3, %v882_v32, %v884_v23  ;;  %v896_v34 = vsel %vm895_vm3, %v880_v22, %v882_v32  ;;  %v1433_v43 = vpop.permute.xlu1 %1432  ;;  %v4597_v32 = vld [vmem:[%s6169_s7 + $0x50] sm:$0xff] }
 0x1a1   : > { %948 = vmatprep.subr.mxu0 %v897_v33 }
 0x1a2   : > { %949 = vmatpush1.msra.mxu0 %v896_v34 }
 0x1a3   : > { %4558 = vmatmul.mubr.msk.f32.vlgmr.msra.gmra.mxu0 %vm905_vm5, %v5193_v12  ;;  %4797 = vmatprep.subr.msk.mxu0 %vm569_vm1, %v5090_v14  ;;  %v886_v37 = vpop.permute.xlu0 %885  ;;  %v1451_v12 = vsel %vm1446_vm7, %v5246_v57, %v5240_v56  ;;  %v4579_v56 = vld [vmem:[%s6169_s7 + $0x30] sm:$0xff]  ;;  %v1447_v57 = vsel %vm1446_vm7, %v5303_v26, %v1433_v43  ;;  %v1849_v26 = vsel %vm1844_vm9, %v5281_v3, %v5273_v0 }
 0x1a4   : > { %4798 = vmatpush3.msk.msra.mxu0 %vm569_vm1, %v5090_v14  ;;  %v898_v38 = vsel %vm895_vm3, %v884_v23, %v886_v37  ;;  %988 = vmatprep.mubr.f32.mxu0 %v4968_v1  ;;  %v1252_v14 = vsel %vm1247_vm6, %v5216_v55, %v5259_v60  ;;  %v2047_v37 = vsel %vm2043_vm10, %v5293_v17, %v5295_v18 }
 0x1a5   : > { %4792 = vmatprep.subr.mxu1 %v898_v38  ;;  %4799 = vmatprep.subr.mxu0 %v5172_v48 }
 0x1a6   : > { %4793 = vmatpush3.msra.mxu1 %v898_v38  ;;  %4800 = vmatpush3.msra.mxu0 %v5172_v48  ;;  %v5368_v48 = vpop.permute.xlu1 %2230 }
 0x1a7   : > { %4559 = vmatmul.mubr.msk.f32.gmra.mxu0 %vm905_vm5, %v4555_v39  ;;  %4795 = vmatmul.mubr.msk.f32.vlgmr.msra.gmra.mxu1 %vm905_vm5, %v4555_v39  ;;  %v1234_v40 = vpop.permute.xlu0 %1233  ;;  %v2248_v39 = vsel %vm2242_vm11, %v5301_v21, %v5299_v20 }
 0x1a8   : > { %4563 = vmatprep.subr.msk.mxu1 %vm569_vm1, %v5067_v6  ;;  %4572 = vmatprep.subr.msk.mxu0 %vm569_vm1, %v1252_v14  ;;  %v1251_v6 = vsel %vm1247_vm6, %v5225_v7, %v5216_v55  ;;  %v1249_v45 = vsel %vm1247_vm6, %v1234_v40, %v1236_v25  ;;  %v1650_v7 = vsel %vm1645_vm8, %v5279_v2, %v5255_v59 }
 0x1a9   : > { %4564 = vmatpush1.msk.msra.mxu1 %vm569_vm1, %v5086_v13  ;;  %1140 = vmatprep.mubr.f32.mxu1 %v4968_v1  ;;  %v1253_v13 = vsel %vm1247_vm6, %v5259_v60, %v5230_v8  ;;  %v1448_v8 = vsel %vm1446_vm7, %v1433_v43, %v5305_v27  ;;  %v1850_v2 = vsel %vm1844_vm9, %v5273_v0, %v5287_v5 }
 0x1aa   : > { %1106 = vmatprep.subr.mxu1 %v5206_v52  ;;  %4801 = vmatprep.mubr.msk.f32.mxu0 %vm905_vm5, %v870_v41  ;;  %v4571_v52 = vld [vmem:[%s6169_s7 + $0x28] sm:$0xf]  ;;  %v5398_v55 = vpop.permute.xlu1 %2236 }
 0x1ab   : > { %1107 = vmatpush1.msra.mxu1 %v5169_v46  ;;  %4802 = vmatmul.mubr.msk.f32.vlgmr.msra.gmra.mxu0 %vm905_vm5, %v871_v42  ;;  %v1238_v44 = vpop.permute.xlu0 %1237  ;;  %v1248_v46 = vsel %vm1247_vm6, %v1232_v24, %v1234_v40  ;;  %v4607_v40 = vld [vmem:[%s6169_s7 + $0x68] sm:$0xf]  ;;  %v2247_v20 = vsel %vm2242_vm11, %v5398_v55, %v5301_v21  ;;  %v4615_v21 = vld [vmem:[%s6169_s7 + $0x70] sm:$0xff] }
 0x1ac   : > { %4565 = vmatmul.mubr.msk.f32.vlgmr.msra.gmra.mxu1 %vm905_vm5, %v870_v41  ;;  %4573 = vmatpush1.msk.msra.mxu0 %vm569_vm1, %v1251_v6  ;;  %v1250_v47 = vsel %vm1247_vm6, %v1236_v25, %v1238_v44  ;;  %v4589_v25 = vld [vmem:[%s6169_s7 + $0x48] sm:$0xf]  ;;  %v4616_v44 = vld [vmem:[%s6169_s7 + $0x78] sm:$0xf] }
 0x1ad   : > { %4804 = vmatprep.subr.msk.mxu1 %vm569_vm1, %v1253_v13  ;;  %1299 = vmatprep.subr.mxu0 %v1249_v45 }
 0x1ae   : > { %4805 = vmatpush3.msk.msra.mxu1 %vm569_vm1, %v1253_v13  ;;  %1300 = vmatpush1.msra.mxu0 %v1248_v46  ;;  %v1831_v4 = vpop.permute.xlu1 %1830 }
 0x1af   : > { %4806 = vmatprep.subr.mxu1 %v1250_v47  ;;  %1146 = vmatprep.mubr.f32.mxu1 %v4968_v1  ;;  %v1437_v50 = vpop.permute.xlu0 %1436  ;;  %v1846_v0 = vsel %vm1844_vm9, %v1831_v4, %v5315_v16 }
 0x1b0   : > { %1333 = vmatprep.mubr.f32.mxu0 %v4968_v1  ;;  %4807 = vmatpush3.msra.mxu1 %v1250_v47  ;;  %v1449_v51 = vsel %vm1446_vm7, %v5305_v27, %v1437_v50 }
 0x1b1   : > { %4811 = vmatprep.subr.msk.mxu0 %vm569_vm1, %v1452_v11  ;;  %4566 = vmatmul.mubr.msk.f32.gmra.mxu1 %vm905_vm5, %v871_v42 }
 0x1b2   : > { %4574 = vmatmul.mubr.msk.f32.vlgmr.msra.gmra.mxu0 %vm905_vm5, %v4570_v49  ;;  %4581 = vmatprep.subr.msk.mxu1 %vm569_vm1, %v1451_v12  ;;  %v5454_v5 = vpop.permute.xlu1 %2437  ;;  %v4624_v12 = vld [vmem:[%s6169_s7 + $0x80] sm:$0xff] }
 0x1b3   : > { %4812 = vmatpush3.msk.msra.mxu0 %vm569_vm1, %v1452_v11  ;;  %1339 = vmatprep.mubr.f32.mxu0 %v4968_v1  ;;  %v5392_v53 = vpop.permute.xlu0 %2234 }
 0x1b4   : > { %4813 = vmatprep.subr.mxu0 %v1449_v51  ;;  %4808 = vmatprep.mubr.msk.f32.mxu1 %vm905_vm5, %v4570_v49 }
 0x1b5   : > { %4814 = vmatpush3.msra.mxu0 %v1449_v51  ;;  %4809 = vmatmul.mubr.msk.f32.vlgmr.msra.gmra.mxu1 %vm905_vm5, %v4571_v52 }
 0x1b6   : > { %4575 = vmatmul.mubr.msk.f32.gmra.mxu0 %vm905_vm5, %v4571_v52  ;;  %4582 = vmatpush1.msk.msra.mxu1 %vm569_vm1, %v1450_v54  ;;  %v5480_v33 = vpop.permute.xlu1 %2433 }
 0x1b7   : > { %4590 = vmatprep.subr.msk.mxu0 %vm569_vm1, %v1650_v7  ;;  %1498 = vmatprep.subr.mxu1 %v1448_v8  ;;  %v5417_v60 = vpop.permute.xlu0 %2435 }
 0x1b8   : > { %1499 = vmatpush1.msra.mxu1 %v1447_v57  ;;  %1532 = vmatprep.mubr.f32.mxu1 %v4968_v1  ;;  %v2446_v46 = vsel %vm2441_vm12, %v5417_v60, %v5454_v5  ;;  %v2445_v50 = vsel %vm2441_vm12, %v5480_v33, %v5417_v60 }
 0x1b9   : > { %4815 = vmatprep.mubr.msk.f32.mxu0 %vm905_vm5, %v4579_v56  ;;  %4818 = vmatprep.subr.msk.mxu1 %vm569_vm1, %v1651_v10 }
 0x1ba   : > { %4583 = vmatmul.mubr.msk.f32.vlgmr.msra.gmra.mxu1 %vm905_vm5, %v4579_v56  ;;  %4816 = vmatmul.mubr.msk.f32.vlgmr.msra.gmra.mxu0 %vm905_vm5, %v4580_v58  ;;  %v2229_v38 = vpop.permute.xlu1 %2228 }
 0x1bb   : > { %4591 = vmatpush1.msk.msra.mxu0 %vm569_vm1, %v1649_v63  ;;  %4819 = vmatpush3.msk.msra.mxu1 %vm569_vm1, %v1651_v10  ;;  %v1632_v59 = vpop.permute.xlu0 %1631  ;;  %v2244_v6 = vsel %vm2242_vm11, %v2229_v38, %v5368_v48 }
 0x1bc   : > { %1538 = vmatprep.mubr.f32.mxu1 %v4968_v1  ;;  %v1646_v62 = vsel %vm1645_vm8, %v5307_v28, %v1632_v59  ;;  %v1647_v22 = vsel %vm1645_vm8, %v1632_v59, %v5309_v29  ;;  %1731 = vmatprep.mubr.f32.mxu0 %v4968_v1  ;;  %v1848_v28 = vsel %vm1844_vm9, %v5291_v15, %v5281_v3  ;;  %v4598_v3 = vld [vmem:[%s6169_s7 + $0x58] sm:$0xf] }
 0x1bd   : > { %1697 = vmatprep.subr.mxu0 %v1647_v22  ;;  %v1845_v15 = vsel %vm1844_vm9, %v5311_v30, %v1831_v4  ;;  %v2048_v30 = vsel %vm2043_vm10, %v5295_v18, %v5289_v9  ;;  %v4606_v18 = vld [vmem:[%s6169_s7 + $0x60] sm:$0xff] }
 0x1be   : > { %4584 = vmatmul.mubr.msk.f32.gmra.mxu1 %vm905_vm5, %v4580_v58  ;;  %1698 = vmatpush1.msra.mxu0 %v1646_v62  ;;  %v2430_v41 = vpop.permute.xlu1 %2429 }
 0x1bf   : > { %4592 = vmatmul.mubr.msk.f32.vlgmr.msra.gmra.mxu0 %vm905_vm5, %v4588_v61  ;;  %4825 = vmatprep.subr.msk.mxu0 %vm569_vm1, %v1850_v2  ;;  %v1636_v23 = vpop.permute.xlu0 %1635 }
 0x1c0   : > { %4826 = vmatpush3.msk.msra.mxu0 %vm569_vm1, %v1850_v2  ;;  %v1648_v24 = vsel %vm1645_vm8, %v5309_v29, %v1636_v23  ;;  %1737 = vmatprep.mubr.f32.mxu0 %v4968_v1 }
 0x1c1   : > { %4820 = vmatprep.subr.mxu1 %v1648_v24  ;;  %4822 = vmatprep.mubr.msk.f32.mxu1 %vm905_vm5, %v4588_v61 }
 0x1c2   : > { %4821 = vmatpush3.msra.mxu1 %v1648_v24  ;;  %v2440_v45 = vpop.permute.xlu1 %2439 }
 0x1c3   : > { %4593 = vmatmul.mubr.msk.f32.gmra.mxu0 %vm905_vm5, %v4589_v25  ;;  %4823 = vmatmul.mubr.msk.f32.vlgmr.msra.gmra.mxu1 %vm905_vm5, %v4589_v25  ;;  %v1835_v27 = vpop.permute.xlu0 %1834 }
 0x1c4   : > { %4599 = vmatprep.subr.msk.mxu1 %vm569_vm1, %v1849_v26  ;;  %v1847_v29 = vsel %vm1844_vm9, %v5315_v16, %v1835_v27  ;;  %1930 = vmatprep.mubr.f32.mxu1 %v4968_v1  ;;  %v2049_v16 = vsel %vm2043_vm10, %v5289_v9, %v5297_v19 }
 0x1c5   : > { %4600 = vmatpush1.msk.msra.mxu1 %vm569_vm1, %v1848_v28  ;;  %4827 = vmatprep.subr.mxu0 %v1847_v29  ;;  %v816_v28 = vand.u32 127, %v783_v35 }
 0x1c6   : > { %1896 = vmatprep.subr.mxu1 %v1846_v0  ;;  %4828 = vmatpush3.msra.mxu0 %v1847_v29 }
 0x1c7   : > { %1897 = vmatpush1.msra.mxu1 %v1845_v15  ;;  %4829 = vmatprep.mubr.msk.f32.mxu0 %vm905_vm5, %v4597_v32  ;;  %v2227_v34 = vpop.permute.xlu0 %2226 }
 0x1c8   : > { %4601 = vmatmul.mubr.msk.f32.vlgmr.msra.gmra.mxu1 %vm905_vm5, %v4597_v32  ;;  %4830 = vmatmul.mubr.msk.f32.vlgmr.msra.gmra.mxu0 %vm905_vm5, %v4598_v3  ;;  %v2243_v13 = vsel %vm2242_vm11, %v2227_v34, %v2229_v38  ;;  %v5583_v33 = vmul.u32.u64.low 2863311531, %v816_v28  ;;  %v5584_v34 = vmul.u32.u64.high 2863311531, %v816_v28, %v5583_v33 }
 0x1c9   : > { %4608 = vmatprep.subr.msk.mxu0 %vm569_vm1, %v2048_v30  ;;  %4832 = vmatprep.subr.msk.mxu1 %vm569_vm1, %v2049_v16 }
 0x1ca   : > { %4609 = vmatpush1.msk.msra.mxu0 %vm569_vm1, %v2047_v37  ;;  %4833 = vmatpush3.msk.msra.mxu1 %vm569_vm1, %v2049_v16  ;;  %v825_v38 = vshrl.u32 %v5584_v34, 4 }
 0x1cb   : > { %1936 = vmatprep.mubr.f32.mxu1 %v4968_v1  ;;  %v2030_v19 = vpop.permute.xlu0 %2029  ;;  %2129 = vmatprep.mubr.f32.mxu0 %v4968_v1 }
 0x1cc   : > { %4602 = vmatmul.mubr.msk.f32.gmra.mxu1 %vm905_vm5, %v4598_v3  ;;  %v2044_v9 = vsel %vm2043_vm10, %v5313_v31, %v2030_v19  ;;  %v2045_v17 = vsel %vm2043_vm10, %v2030_v19, %v5319_v36 }
 0x1cd   : > { %2095 = vmatprep.subr.mxu0 %v2045_v17  ;;  %4836 = vmatprep.mubr.msk.f32.mxu1 %vm905_vm5, %v4606_v18  ;;  %v817_v17 = vadd.s32 128, %v816_v28 }
 0x1ce   : > { %2096 = vmatpush1.msra.mxu0 %v2044_v9  ;;  %v818_v9 = vadd.s32 256, %v816_v28 }
 0x1cf   : > { %4610 = vmatmul.mubr.msk.f32.vlgmr.msra.gmra.mxu0 %vm905_vm5, %v4606_v18  ;;  %4839 = vmatprep.subr.msk.mxu0 %vm569_vm1, %v2248_v39  ;;  %v2034_v31 = vpop.permute.xlu0 %2033 }
 0x1d0   : > { %4840 = vmatpush3.msk.msra.mxu0 %vm569_vm1, %v2248_v39  ;;  %v2046_v14 = vsel %vm2043_vm10, %v5319_v36, %v2034_v31  ;;  %2135 = vmatprep.mubr.f32.mxu0 %v4968_v1  ;;  %v2246_v36 = vsel %vm2242_vm11, %v5392_v53, %v5398_v55  ;;  %v4625_v53 = vld [vmem:[%s6169_s7 + $0x88] sm:$0xf]  ;;  %v5595_v39 = vmul.u32.u64.low 2863311531, %v818_v9  ;;  %v5596_v31 = vmul.u32.u64.high 2863311531, %v818_v9, %v5595_v39 }
 0x1d1   : > { %4834 = vmatprep.subr.mxu1 %v2046_v14 }
 0x1d2   : > { %4835 = vmatpush3.msra.mxu1 %v2046_v14 }
 0x1d3   : > { %4611 = vmatmul.mubr.msk.f32.gmra.mxu0 %vm905_vm5, %v4607_v40  ;;  %4837 = vmatmul.mubr.msk.f32.vlgmr.msra.gmra.mxu1 %vm905_vm5, %v4607_v40  ;;  %v2233_v42 = vpop.permute.xlu0 %2232 }
 0x1d4   : > { %4617 = vmatprep.subr.msk.mxu1 %vm569_vm1, %v2247_v20  ;;  %v2245_v43 = vsel %vm2242_vm11, %v5368_v48, %v2233_v42  ;;  %2328 = vmatprep.mubr.f32.mxu1 %v4968_v1  ;;  %v2447_v48 = vsel %vm2441_vm12, %v5454_v5, %v2440_v45  ;;  %v5598_v40 = vmul.u32.u64.low 2863311531, %v817_v17  ;;  %v5599_v20 = vmul.u32.u64.high 2863311531, %v817_v17, %v5598_v40 }
 0x1d5   : > { %4618 = vmatpush1.msk.msra.mxu1 %vm569_vm1, %v2246_v36  ;;  %4841 = vmatprep.subr.mxu0 %v2245_v43 }
 0x1d6   : > { %2294 = vmatprep.subr.mxu1 %v2244_v6  ;;  %4842 = vmatpush3.msra.mxu0 %v2245_v43  ;;  %v826_v43 = vmul.u32 24, %v825_v38 }
 0x1d7   : > { %2295 = vmatpush1.msra.mxu1 %v2243_v13  ;;  %4843 = vmatprep.mubr.msk.f32.mxu0 %vm905_vm5, %v4615_v21  ;;  %v2428_v47 = vpop.permute.xlu0 %2427 }
 0x1d8   : > { %4619 = vmatmul.mubr.msk.f32.vlgmr.msra.gmra.mxu1 %vm905_vm5, %v4615_v21  ;;  %4844 = vmatmul.mubr.msk.f32.vlgmr.msra.gmra.mxu0 %vm905_vm5, %v4616_v44  ;;  %v2443_v49 = vsel %vm2441_vm12, %v2428_v47, %v2430_v41 }
 0x1d9   : > { %4626 = vmatprep.subr.msk.mxu0 %vm569_vm1, %v2446_v46  ;;  %4846 = vmatprep.subr.msk.mxu1 %vm569_vm1, %v2447_v48  ;;  %v847_v46 = vshrl.u32 %v5596_v31, 4 }
 0x1da   : > { %4627 = vmatpush1.msk.msra.mxu0 %vm569_vm1, %v2445_v50  ;;  %4847 = vmatpush3.msk.msra.mxu1 %vm569_vm1, %v2447_v48 }
 0x1db   : > { %2493 = vmatprep.subr.mxu0 %v2443_v49  ;;  %2334 = vmatprep.mubr.f32.mxu1 %v4968_v1  ;;  %v2426_v11 = vpop.permute.xlu0 %2425 }
 0x1dc   : > { %4620 = vmatmul.mubr.msk.f32.gmra.mxu1 %vm905_vm5, %v4616_v44  ;;  %v2442_v51 = vsel %vm2441_vm12, %v2426_v11, %v2428_v47  ;;  %2527 = vmatprep.mubr.f32.mxu0 %v4968_v1  ;;  %v5605_v47 = vsub.s32 %v816_v28, %v826_v43 }
 0x1dd   : > { %2494 = vmatpush1.msra.mxu0 %v2442_v51  ;;  %4850 = vmatprep.mubr.msk.f32.mxu1 %vm905_vm5, %v4624_v12 }
 0x1de   : > { %4628 = vmatmul.mubr.msk.f32.vlgmr.msra.gmra.mxu0 %vm905_vm5, %v4624_v12  ;;  %v836_v12 = vshrl.u32 %v5599_v20, 4  ;;  %vm852_vm13 = vcmp.ne.s32.totalorder %v5605_v47, 0  ;;  %vm855_vm14 = vcmp.lt.s32.totalorder %v5605_v47, 0 }
 0x1df   : > { %v2432_v52 = vpop.permute.xlu0 %2431  ;;  %2533 = vmatprep.mubr.f32.mxu0 %v4968_v1  ;;  %vm5614_vm15 = vmand %vm855_vm14, %vm852_vm13 }
 0x1e0   : > { %v2444_v54 = vsel %vm2441_vm12, %v2430_v41, %v2432_v52 }
 0x1e1   : > { %4848 = vmatprep.subr.mxu1 %v2444_v54 }
 0x1e2   : > { %4629 = vmatmul.mubr.msk.f32.gmra.mxu0 %vm905_vm5, %v4625_v53  ;;  %4849 = vmatpush3.msra.mxu1 %v2444_v54 }
 0x1e3   : > { %4851 = vmatmul.mubr.msk.f32.vlgmr.msra.gmra.mxu1 %vm905_vm5, %v4625_v53 }
 0x1e4   : > { %2801 = vmatprep.mubr.f32.mxu1 %v4968_v1 }
 0x263   : > { %v984_v55 = vpop.f32.mrf.mxu0 }
 0x265   : > { %v986_v7 = vpop.f32.mrf.mxu0 }
 0x267   : > { %v990_v8 = vpop.f32.mrf.mxu0  ;;  %v4796_v56 = vpop.f32.mrf.mxu1 }
 0x269   : > { %v992_v57 = vpop.f32.mrf.mxu0  ;;  %v1061_v58 = vpop.f32.mrf.mxu1 }
 0x26b   : > { %v4803_v60 = vpop.f32.mrf.mxu0 }
 0x26c   : > { %v1142_v10 = vpop.f32.mrf.mxu1  ;;  %v1225_v48 = vadd.f32 %v4803_v60, %v4796_v56  ;;  %v837_v60 = vmul.u32 24, %v836_v12 }
 0x26d   : > { %v1219_v4 = vpop.f32.mrf.mxu0  ;;  %v1143_v41 = vadd.f32 %v1142_v10, %v984_v55 }
 0x26e   : > { %v1144_v63 = vpop.f32.mrf.mxu1  ;;  %v1220_v10 = vadd.f32 %v1219_v4, %v1061_v58 }
 0x26f   : > { %v1145_v6 = vadd.f32 %v1144_v63, %v986_v7  ;;  %v848_v7 = vmul.u32 24, %v847_v46 }
 0x271   : > { %v1148_v59 = vpop.f32.mrf.mxu1 }
 0x272   : > { %v1335_v62 = vpop.f32.mrf.mxu0  ;;  %v1149_v51 = vadd.f32 %v1148_v59, %v990_v8 }
 0x273   : > { %v1150_v22 = vpop.f32.mrf.mxu1  ;;  %v1421_v44 = vadd.f32 %v1335_v62, %v1143_v41 }
 0x274   : > { %v1337_v61 = vpop.f32.mrf.mxu0  ;;  %v1151_v49 = vadd.f32 %v1150_v22, %v992_v57  ;;  %v861_v57 = vadd.s32 24, %v5605_v47 }
 0x275   : > { %v4810_v2 = vpop.f32.mrf.mxu1  ;;  %v1422_v52 = vadd.f32 %v1337_v61, %v1145_v6 }
 0x276   : > { %v1341_v23 = vpop.f32.mrf.mxu0  ;;  %v1426_v63 = vadd.f32 %v4810_v2, %v1225_v48 }
 0x277   : > { %v5576_v24 = vpop.f32.mrf.mxu1  ;;  %v1424_v22 = vadd.f32 %v1341_v23, %v1149_v51  ;;  %v864_v23 = vsel %vm5614_vm15, %v861_v57, %v5605_v47 }
 0x278   : > { %v1343_v25 = vpop.f32.mrf.mxu0  ;;  %v1423_v34 = vadd.f32 %v5576_v24, %v1220_v10  ;;  %vm5638_vm5 = vcmp.lt.s32.totalorder %v864_v23, 16 }
 0x279   : > { %v1425_v62 = vadd.f32 %v1343_v25, %v1151_v49 }
 0x27a   : > { %v1534_v5 = vpop.f32.mrf.mxu1  ;;  %v4817_v26 = vpop.f32.mrf.mxu0 }
 0x27b   : > { %v1620_v53 = vadd.f32 %v1534_v5, %v1421_v44  ;;  %v5618_v5 = vsub.s32 %v818_v9, %v848_v7  ;;  %v1625_v58 = vadd.f32 %v4817_v26, %v1426_v63  ;;  %v2631_v63 = vpop.permute.xlu1 %2630 }
 0x27c   : > { %v1536_v27 = vpop.f32.mrf.mxu1  ;;  %v5579_v29 = vpop.f32.mrf.mxu0 }
 0x27d   : > { %v1621_v28 = vadd.f32 %v1536_v27, %v1422_v52  ;;  %v5624_v27 = vsub.s32 %v817_v17, %v837_v60  ;;  %v1622_v38 = vadd.f32 %v5579_v29, %v1423_v34  ;;  %vm854_vm0 = vcmp.ne.s32.totalorder %v5618_v5, 0 }
 0x27e   : > { %v5581_v32 = vpop.f32.mrf.mxu1  ;;  %vm857_vm1 = vcmp.lt.s32.totalorder %v5618_v5, 0  ;;  %v863_v41 = vadd.s32 24, %v5618_v5 }
 0x27f   : > { %v1733_v0 = vpop.f32.mrf.mxu0  ;;  %v1623_v39 = vadd.f32 %v5581_v32, %v1424_v22  ;;  %v2626_v32 = vpop.permute.xlu0 %2625  ;;  %vm853_vm2 = vcmp.ne.s32.totalorder %v5624_v27, 0  ;;  %vm5646_vm13 = vmand %vm857_vm1, %vm854_vm0  ;;  %vm856_vm14 = vcmp.lt.s32.totalorder %v5624_v27, 0  ;;  %v862_v51 = vadd.s32 24, %v5624_v27 }
 0x280   : > { %v1542_v3 = vpop.f32.mrf.mxu1  ;;  %v1819_v56 = vadd.f32 %v1733_v0, %v1620_v53  ;;  %v866_v10 = vsel %vm5646_vm13, %v863_v41, %v5618_v5  ;;  %vm5662_vm15 = vmand %vm856_vm14, %vm853_vm2  ;;  %vm2675_vm2 = vcmask 203776  }
 0x281   : > { %v1735_v15 = vpop.f32.mrf.mxu0  ;;  %v1624_v25 = vadd.f32 %v1542_v3, %v1425_v62  ;;  %vm869_vm0 = vcmp.lt.s32.totalorder %v866_v10, 16  ;;  %vm4644_vm13 = vmneg %vm2675_vm2 }
 0x282   : > { %v1820_v4 = vadd.f32 %v1735_v15, %v1621_v28 }
 0x283   : > { %v5586_v16 = vpop.f32.mrf.mxu0  ;;  %v4824_v30 = vpop.f32.mrf.mxu1 }
 0x284   : > { %v1822_v3 = vadd.f32 %v5586_v16, %v1623_v39 }
 0x285   : > { %v5588_v37 = vpop.f32.mrf.mxu0  ;;  %v5590_v19 = vpop.f32.mrf.mxu1 }
 0x286   : > { %v1823_v24 = vadd.f32 %v5588_v37, %v1624_v25  ;;  %v1821_v15 = vadd.f32 %v5590_v19, %v1622_v38 }
 0x288   : > { %v1932_v35 = vpop.f32.mrf.mxu1  ;;  %v5592_v18 = vpop.f32.mrf.mxu0 }
 0x289   : > { %v2018_v61 = vadd.f32 %v1932_v35, %v1819_v56  ;;  %v1824_v35 = vadd.f32 %v4824_v30, %v1625_v58 }
 0x28a   : > { %v1934_v14 = vpop.f32.mrf.mxu1  ;;  %v5601_v42 = vpop.f32.mrf.mxu0 }
 0x28b   : > { %v2019_v9 = vadd.f32 %v1934_v14, %v1820_v4  ;;  %v2023_v17 = vadd.f32 %v5592_v18, %v1824_v35  ;;  %v2020_v37 = vadd.f32 %v5601_v42, %v1821_v15  ;;  %v4439_v18 = vld [vmem:[%s6172_s10] sm:$0xff] }
 0x28c   : > { %v5603_v36 = vpop.f32.mrf.mxu1 }
 0x28d   : > { %v2021_v43 = vadd.f32 %v5603_v36, %v1822_v3 }
 0x28e   : > { %v1940_v13 = vpop.f32.mrf.mxu1 }
 0x28f   : > { %v2131_v21 = vpop.f32.mrf.mxu0  ;;  %v2022_v30 = vadd.f32 %v1940_v13, %v1823_v24 }
 0x290   : > { %v2217_v0 = vadd.f32 %v2131_v21, %v2018_v61  ;;  %v865_v61 = vsel %vm5662_vm15, %v862_v51, %v5624_v27 }
 0x291   : > { %v2133_v45 = vpop.f32.mrf.mxu0  ;;  %vm868_vm1 = vcmp.lt.s32.totalorder %v865_v61, 16 }
 0x292   : > { %v2218_v29 = vadd.f32 %v2133_v45, %v2019_v9 }
 0x293   : > { %v5608_v50 = vpop.f32.mrf.mxu0  ;;  %v4838_v11 = vpop.f32.mrf.mxu1 }
 0x294   : > { %v2222_v21 = vadd.f32 %v4838_v11, %v2023_v17  ;;  %v2220_v42 = vadd.f32 %v5608_v50, %v2021_v43 }
 0x295   : > { %v2139_v54 = vpop.f32.mrf.mxu0  ;;  %v2208_v55 = vpop.f32.mrf.mxu1 }
 0x296   : > { %v2221_v19 = vadd.f32 %v2139_v54, %v2022_v30  ;;  %v2219_v36 = vadd.f32 %v2208_v55, %v2020_v37 }
 0x298   : > { %v2330_v33 = vpop.f32.mrf.mxu1  ;;  %v4845_v8 = vpop.f32.mrf.mxu0 }
 0x299   : > { %v2416_v26 = vadd.f32 %v2330_v33, %v2217_v0  ;;  %v2421_v45 = vadd.f32 %v4845_v8, %v2222_v21 }
 0x29a   : > { %v2332_v2 = vpop.f32.mrf.mxu1  ;;  %v2407_v31 = vpop.f32.mrf.mxu0 }
 0x29b   : > { %v2417_v6 = vadd.f32 %v2332_v2, %v2218_v29  ;;  %v2418_v52 = vadd.f32 %v2407_v31, %v2219_v36 }
 0x29c   : > { %v2336_v40 = vpop.f32.mrf.mxu1 }
 0x29d   : > { %v2419_v53 = vadd.f32 %v2336_v40, %v2220_v42 }
 0x29e   : > { %v2529_v20 = vpop.f32.mrf.mxu0  ;;  %v2338_v16 = vpop.f32.mrf.mxu1 }
 0x29f   : > { %v2615_v14 = vadd.f32 %v2529_v20, %v2416_v26  ;;  %v2420_v49 = vadd.f32 %v2338_v16, %v2221_v19  ;;  %v5747_v20 = vld [vmem:[%s6171_s9 + $0x10] sm:$0xff]  ;;  %v4440_v16 = vld [vmem:[%s6172_s10 + $0x8] sm:$0xf] }
 0x2a0   : > { %v2531_v44 = vpop.f32.mrf.mxu0 }
 0x2a1   : > { %v2633_v47 = vadd.f32 %v2626_v32, %v2615_v14  ;;  %v2616_v46 = vadd.f32 %v2531_v44, %v2417_v6 }
 0x2a2   : > { %v2535_v48 = vpop.f32.mrf.mxu0 }
 0x2a3   : > { %v2639_v11 = vmax.f32 %v2633_v47, 0.0  ;;  %v4852_v12 = vpop.f32.mrf.mxu1  ;;  %v2634_v57 = vadd.f32 %v2626_v32, %v2616_v46  ;;  %v2618_v60 = vadd.f32 %v2535_v48, %v2419_v53 }
 0x2a4   : > { %v2620_v54 = vadd.f32 %v4852_v12, %v2421_v45  ;;  %v2537_v7 = vpop.f32.mrf.mxu0 }
 0x2a5   : > { %v2619_v62 = vadd.f32 %v2537_v7, %v2420_v49  ;;  %v2606_v50 = vpop.f32.mrf.mxu1  ;;  %v2651_v55 = vsel %vm5638_vm5, %v2639_v11, 0.0  ;;  %v2640_v5 = vmax.f32 %v2634_v57, 0.0  ;;  %v2636_v34 = vadd.f32 %v2631_v63, %v2618_v60 }
 0x2a6   : > { %v2638_v22 = vadd.f32 %v2631_v63, %v2620_v54  ;;  %v2617_v28 = vadd.f32 %v2606_v50, %v2418_v52  ;;  %2663 = vrot.lane.b32.xlu0 %v2651_v55, %s4978_s24 }
 0x2a7   : > { %v2637_v8 = vadd.f32 %v2631_v63, %v2619_v62  ;;  %v2642_v0 = vmax.f32 %v2636_v34, 0.0  ;;  %v2652_v23 = vsel %vm868_vm1, %v2640_v5, 0.0 }
 0x2a8   : > { %v2644_v33 = vmax.f32 %v2638_v22, 0.0  ;;  %v2635_v59 = vadd.f32 %v2626_v32, %v2617_v28 }
 0x2a9   : > { %v2643_v2 = vmax.f32 %v2637_v8, 0.0  ;;  %v2654_v39 = vsel %vm5638_vm5, %v2642_v0, 0.0  ;;  %vm2724_vm5 = vcmask 97280  }
 0x2aa   : > { %v2641_v58 = vmax.f32 %v2635_v59, 0.0  ;;  %v2656_v4 = vsel %vm869_vm0, %v2644_v33, 0.0  ;;  %4857 = vmatprep.mubr.msk.f32.mxu0 %vm2724_vm5, %v5747_v20 }
 0x2ab   : > { %2673 = vrot.lane.b32.xlu1 %v2656_v4, %s4978_s24  ;;  %v2655_v38 = vsel %vm868_vm1, %v2643_v2, 0.0 }
 0x2ac   : > { %v2653_v25 = vsel %vm869_vm0, %v2641_v58, 0.0  ;;  %v4634_v58 = vld [vmem:[%s6171_s9 + $0x18] sm:$0xf] }
 0x2ad   : > { %2667 = vrot.lane.b32.xlu0 %v2653_v25, %s4978_s24  ;;  %v2690_v25 = vld [vmem:[%s6171_s9] sm:$0xff] }
 0x2af   : > { %2665 = vrot.lane.b32.xlu1 %v2652_v23, %s4978_s24 }
 0x2b1   : > { %2671 = vrot.lane.b32.xlu0 %v2655_v38, %s4978_s24 }
 0x2b3   : > { %2669 = vrot.lane.b32.xlu1 %v2654_v39, %s4978_s24 }
 0x318   : > { %v5671_v27 = vpop.permute.xlu0 %2663 }
 0x319   : > { %v5675_v35 = vsel %vm2675_vm2, 0.0, %v5671_v27 }
 0x31a   : > { %2699 = vrot.lane.b32.xlu0 %v5675_v35, %s4970_s14 }
 0x31d   : > { %v2674_v9 = vpop.permute.xlu1 %2673 }
 0x31e   : > { %v5680_v31 = vsel %vm2675_vm2, %v2674_v9, 0.0  ;;  %3056 = vrot.lane.b32.xlu0 %v5675_v35, %s4971_s17 }
 0x31f   : > { %2713 = vrot.lane.b32.xlu1 %v5680_v31, %s4970_s14  ;;  %v2668_v26 = vpop.permute.xlu0 %2667 }
 0x320   : > { %v2688_v3 = vsel %vm2675_vm2, %v2668_v26, 0.0 }
 0x321   : > { %v2666_v40 = vpop.permute.xlu1 %2665 }
 0x322   : > { %3254 = vrot.lane.b32.xlu0 %v5675_v35, %s4972_s18  ;;  %v5704_v24 = vsel %vm2675_vm2, %v5671_v27, %v2666_v40  ;;  %v5712_v15 = vsel %vm2675_vm2, %v2666_v40, %v2668_v26 }
 0x323   : > { %3070 = vrot.lane.b32.xlu1 %v5680_v31, %s4971_s17  ;;  %v2672_v32 = vpop.permute.xlu0 %2671 }
 0x324   : > { %v5760_v30 = vsel %vm2675_vm2, %v2672_v32, %v2674_v9 }
 0x325   : > { %v2670_v17 = vpop.permute.xlu1 %2669 }
 0x326   : > { %3452 = vrot.lane.b32.xlu0 %v5675_v35, %s4973_s6  ;;  %v5742_v29 = vsel %vm2675_vm2, 0.0, %v2670_v17  ;;  %v5770_v14 = vsel %vm2675_vm2, %v2670_v17, %v2672_v32  ;;  %v4652_v32 = vld [vmem:[%s6171_s9 + $0x28] sm:$0xf] }
 0x327   : > { %3268 = vrot.lane.b32.xlu1 %v5680_v31, %s4972_s18 }
 0x32a   : > { %3650 = vrot.lane.b32.xlu0 %v5675_v35, %s4974_s21 }
 0x32b   : > { %3466 = vrot.lane.b32.xlu1 %v5680_v31, %s4973_s6 }
 0x32e   : > { %3848 = vrot.lane.b32.xlu0 %v5675_v35, %s4975_s22 }
 0x32f   : > { %3664 = vrot.lane.b32.xlu1 %v5680_v31, %s4974_s21 }
 0x332   : > { %2701 = vrot.lane.b32.xlu0 %v5704_v24, %s4970_s14 }
 0x333   : > { %3862 = vrot.lane.b32.xlu1 %v5680_v31, %s4975_s22 }
 0x336   : > { %2705 = vrot.lane.b32.xlu0 %v2688_v3, %s4970_s14 }
 0x337   : > { %2703 = vrot.lane.b32.xlu1 %v5712_v15, %s4970_s14 }
 0x33a   : > { %3058 = vrot.lane.b32.xlu0 %v5704_v24, %s4971_s17 }
 0x33b   : > { %3060 = vrot.lane.b32.xlu1 %v5712_v15, %s4971_s17 }
 0x33e   : > { %3062 = vrot.lane.b32.xlu0 %v2688_v3, %s4971_s17 }
 0x33f   : > { %3256 = vrot.lane.b32.xlu1 %v5704_v24, %s4972_s18 }
 0x342   : > { %3258 = vrot.lane.b32.xlu0 %v5712_v15, %s4972_s18 }
 0x343   : > { %3260 = vrot.lane.b32.xlu1 %v2688_v3, %s4972_s18 }
 0x346   : > { %3454 = vrot.lane.b32.xlu0 %v5704_v24, %s4973_s6 }
 0x347   : > { %3456 = vrot.lane.b32.xlu1 %v5712_v15, %s4973_s6 }
 0x34a   : > { %3458 = vrot.lane.b32.xlu0 %v2688_v3, %s4973_s6 }
 0x34b   : > { %3652 = vrot.lane.b32.xlu1 %v5704_v24, %s4974_s21 }
 0x34e   : > { %3654 = vrot.lane.b32.xlu0 %v5712_v15, %s4974_s21 }
 0x34f   : > { %3656 = vrot.lane.b32.xlu1 %v2688_v3, %s4974_s21 }
 0x352   : > { %3850 = vrot.lane.b32.xlu0 %v5704_v24, %s4975_s22 }
 0x353   : > { %3852 = vrot.lane.b32.xlu1 %v5712_v15, %s4975_s22 }
 0x356   : > { %3262 = vrot.lane.b32.xlu0 %v5742_v29, %s4972_s18 }
 0x357   : > { %2707 = vrot.lane.b32.xlu1 %v5742_v29, %s4970_s14 }
 0x35a   : > { %3658 = vrot.lane.b32.xlu0 %v5742_v29, %s4974_s21 }
 0x35b   : > { %3064 = vrot.lane.b32.xlu1 %v5742_v29, %s4971_s17 }
 0x35e   : > { %2711 = vrot.lane.b32.xlu0 %v5760_v30, %s4970_s14 }
 0x35f   : > { %3460 = vrot.lane.b32.xlu1 %v5742_v29, %s4973_s6 }
 0x362   : > { %3854 = vrot.lane.b32.xlu0 %v2688_v3, %s4975_s22 }
 0x363   : > { %3856 = vrot.lane.b32.xlu1 %v5742_v29, %s4975_s22 }
 0x366   : > { %4054 = vrot.lane.b32.xlu0 %v5742_v29, %s4976_s23 }
 0x367   : > { %2709 = vrot.lane.b32.xlu1 %v5770_v14, %s4970_s14 }
 0x36a   : > { %3068 = vrot.lane.b32.xlu0 %v5760_v30, %s4971_s17 }
 0x36b   : > { %4060 = vrot.lane.b32.xlu1 %v5680_v31, %s4976_s23 }
 0x36e   : > { %4050 = vrot.lane.b32.xlu0 %v5712_v15, %s4976_s23 }
 0x36f   : > { %4048 = vrot.lane.b32.xlu1 %v5704_v24, %s4976_s23 }
 0x372   : > { %3266 = vrot.lane.b32.xlu0 %v5760_v30, %s4972_s18 }
 0x373   : > { %3066 = vrot.lane.b32.xlu1 %v5770_v14, %s4971_s17 }
 0x376   : > { %3464 = vrot.lane.b32.xlu0 %v5760_v30, %s4973_s6 }
 0x377   : > { %4052 = vrot.lane.b32.xlu1 %v2688_v3, %s4976_s23 }
 0x37a   : > { %4046 = vrot.lane.b32.xlu0 %v5675_v35, %s4976_s23 }
 0x37b   : > { %3264 = vrot.lane.b32.xlu1 %v5770_v14, %s4972_s18  ;;  %s4916_s18 = smul.u32 48, %s6183_s20 }
 0x37d   : > { %s408_s20 = scalar_lea.vmem %s6173_s11, %s4916_s18 }
 0x37e   : > { %3662 = vrot.lane.b32.xlu0 %v5760_v30, %s4974_s21 }
 0x37f   : > { %3462 = vrot.lane.b32.xlu1 %v5770_v14, %s4973_s6 }
 0x382   : > { %3860 = vrot.lane.b32.xlu0 %v5760_v30, %s4975_s22 }
 0x383   : > { %4252 = vrot.lane.b32.xlu1 %v5742_v29, %s4977_s26 }
 0x386   : > { %4246 = vrot.lane.b32.xlu0 %v5704_v24, %s4977_s26 }
 0x387   : > { %3660 = vrot.lane.b32.xlu1 %v5770_v14, %s4974_s21 }
 0x38a   : > { %4058 = vrot.lane.b32.xlu0 %v5760_v30, %s4976_s23 }
 0x38b   : > { %3858 = vrot.lane.b32.xlu1 %v5770_v14, %s4975_s22 }
 0x38c   : > { %v5811_v41 = vpop.permute.xlu0 %2699 }
 0x38e   : > { %4256 = vrot.lane.b32.xlu0 %v5760_v30, %s4977_s26 }
 0x38f   : > { %4248 = vrot.lane.b32.xlu1 %v5712_v15, %s4977_s26 }
 0x390   : > { %v5817_v37 = vpop.permute.xlu0 %3056 }
 0x391   : > { %v2714_v43 = vpop.permute.xlu1 %2713 }
 0x392   : > { %4244 = vrot.lane.b32.xlu0 %v5675_v35, %s4977_s26 }
 0x393   : > { %4056 = vrot.lane.b32.xlu1 %v5770_v14, %s4976_s23 }
 0x394   : > { %v5823_v21 = vpop.permute.xlu0 %3254 }
 0x395   : > { %v5825_v6 = vpop.permute.xlu1 %3070 }
 0x396   : > { %4250 = vrot.lane.b32.xlu0 %v2688_v3, %s4977_s26  ;;  %v2691_v3 = vld [vmem:[%s6171_s9 + $0x8] sm:$0xf] }
 0x397   : > { %4254 = vrot.lane.b32.xlu1 %v5770_v14, %s4977_s26 }
 0x398   : > { %v5833_v44 = vpop.permute.xlu0 %3452 }
 0x399   : > { %v5835_v19 = vpop.permute.xlu1 %3268 }
 0x39a   : > { %4448 = vperm.xlu0 %4942, %v4440_v16  }
 0x39b   : > { %4258 = vrot.lane.b32.xlu1 %v5680_v31, %s4977_s26 }
 0x39c   : > { %v3651_v47 = vpop.permute.xlu0 %3650 }
 0x39d   : > { %v5842_v13 = vpop.permute.xlu1 %3466 }
 0x39f   : > { %4443 = vperm.xlu1 %4943, %v4439_v18  }
 0x3a0   : > { %v5844_v42 = vpop.permute.xlu0 %3848 }
 0x3a1   : > { %v5846_v36 = vpop.permute.xlu1 %3664 }
 0x3a4   : > { %v2702_v45 = vpop.permute.xlu0 %2701 }
 0x3a5   : > { %v5848_v46 = vpop.permute.xlu1 %3862  ;;  %v2715_v31 = vsel %vm895_vm3, %v5811_v41, %v2702_v45 }
 0x3a8   : > { %v2706_v48 = vpop.permute.xlu0 %2705 }
 0x3a9   : > { %v2704_v49 = vpop.permute.xlu1 %2703 }
 0x3aa   : > { %v2717_v34 = vsel %vm895_vm3, %v2704_v49, %v2706_v48  ;;  %v2716_v9 = vsel %vm895_vm3, %v2702_v45, %v2704_v49  ;;  %v4660_v49 = vld [vmem:[%s6171_s9 + $0x30] sm:$0xff] }
 0x3ac   : > { %v5850_v11 = vpop.permute.xlu0 %3058 }
 0x3ad   : > { %v5852_v12 = vpop.permute.xlu1 %3060  ;;  %v3072_v16 = vsel %vm1247_vm6, %v5817_v37, %v5850_v11 }
 0x3b0   : > { %v3063_v51 = vpop.permute.xlu0 %3062 }
 0x3b1   : > { %v5854_v52 = vpop.permute.xlu1 %3256 }
 0x3b4   : > { %v5856_v53 = vpop.permute.xlu0 %3258 }
 0x3b5   : > { %v5858_v54 = vpop.permute.xlu1 %3260 }
 0x3b6   : > { %v3272_v48 = vsel %vm1446_vm7, %v5856_v53, %v5858_v54 }
 0x3b8   : > { %v5860_v7 = vpop.permute.xlu0 %3454 }
 0x3b9   : > { %v5862_v10 = vpop.permute.xlu1 %3456 }
 0x3bc   : > { %v5864_v63 = vpop.permute.xlu0 %3458 }
 0x3bd   : > { %v5866_v62 = vpop.permute.xlu1 %3652 }
 0x3be   : > { %v5870_v50 = vsel %vm1844_vm9, %v3651_v47, %v5866_v62 }
 0x3c0   : > { %v5872_v55 = vpop.permute.xlu0 %3654 }
 0x3c1   : > { %v5874_v56 = vpop.permute.xlu1 %3656 }
 0x3c4   : > { %v5876_v57 = vpop.permute.xlu0 %3850 }
 0x3c5   : > { %v5878_v60 = vpop.permute.xlu1 %3852 }
 0x3c8   : > { %v5880_v22 = vpop.permute.xlu0 %3262 }
 0x3c9   : > { %v2708_v28 = vpop.permute.xlu1 %2707 }
 0x3cc   : > { %v5882_v33 = vpop.permute.xlu0 %3658 }
 0x3cd   : > { %v3065_v8 = vpop.permute.xlu1 %3064 }
 0x3d0   : > { %v2712_v59 = vpop.permute.xlu0 %2711 }
 0x3d1   : > { %v2720_v61 = vsel %vm895_vm3, %v2712_v59, %v2714_v43  ;;  %v5885_v5 = vpop.permute.xlu1 %3460 }
 0x3d2   : > { %4853 = vmatprep.subr.msk.mxu0 %vm748_vm4, %v2720_v61 }
 0x3d3   : > { %4854 = vmatpush3.msk.msra.mxu0 %vm748_vm4, %v2720_v61  ;;  %v3468_v61 = vsel %vm1645_vm8, %v5833_v44, %v5860_v7 }
 0x3d4   : > { %4855 = vmatprep.subr.mxu0 %v2717_v34  ;;  %v5893_v4 = vpop.permute.xlu0 %3854 }
 0x3d5   : > { %v5895_v2 = vpop.permute.xlu1 %3856  ;;  %4856 = vmatpush3.msra.mxu0 %v2717_v34 }
 0x3d6   : > { %4642 = vmatprep.subr.msk.mxu0 %vm748_vm4, %v5770_v14  ;;  %4858 = vmatmul.mubr.msk.f32.vlgmr.msra.gmra.mxu0 %vm2724_vm5, %v4634_v58 }
 0x3d7   : > { %4643 = vmatpush1.msk.msra.mxu0 %vm748_vm4, %v5742_v29  ;;  %2965 = vmatprep.mubr.f32.mxu0 %v4968_v1  ;;  %v4651_v29 = vld [vmem:[%s6171_s9 + $0x20] sm:$0xff] }
 0x3d8   : > { %2931 = vmatprep.subr.mxu0 %v5704_v24  ;;  %v5908_v0 = vpop.permute.xlu0 %4054  ;;  %v3074_v24 = vsel %vm1247_vm6, %v5852_v12, %v3063_v51  ;;  %v3270_v51 = vsel %vm1446_vm7, %v5823_v21, %v5854_v52 }
 0x3d9   : > { %v2710_v23 = vpop.permute.xlu1 %2709  ;;  %4645 = vmatpush1.msk.msra.mxu0 %vm4644_vm13, %v5671_v27 }
 0x3da   : > { %v2718_v38 = vsel %vm895_vm3, %v2708_v28, %v2710_v23  ;;  %v2719_v39 = vsel %vm895_vm3, %v2710_v23, %v2712_v59  ;;  %4646 = vmatmul.mubr.msk.f32.vlgmr.msra.gmra.mxu0 %vm2724_vm5, %v2690_v25  ;;  %v3469_v59 = vsel %vm1645_vm8, %v5860_v7, %v5862_v10  ;;  %v4678_v23 = vld [vmem:[%s6171_s9 + $0x50] sm:$0xff] }
 0x3db   : > { %4635 = vmatprep.subr.msk.mxu1 %vm748_vm4, %v2719_v39  ;;  %2971 = vmatprep.mubr.f32.mxu0 %v4968_v1  ;;  %v4679_v39 = vld [vmem:[%s6171_s9 + $0x58] sm:$0xf] }
 0x3dc   : > { %4636 = vmatpush1.msk.msra.mxu1 %vm748_vm4, %v2718_v38  ;;  %v3069_v35 = vpop.permute.xlu0 %3068 }
 0x3dd   : > { %v3077_v27 = vsel %vm1247_vm6, %v3069_v35, %v5825_v6  ;;  %v5922_v40 = vpop.permute.xlu1 %4060  ;;  %2767 = vmatprep.subr.mxu1 %v2716_v9  ;;  %v3073_v6 = vsel %vm1247_vm6, %v5850_v11, %v5852_v12  ;;  %v3271_v12 = vsel %vm1446_vm7, %v5854_v52, %v5856_v53 }
 0x3de   : > { %2768 = vmatpush1.msra.mxu1 %v2715_v31  ;;  %4867 = vmatprep.subr.msk.mxu0 %vm748_vm4, %v3077_v27 }
 0x3df   : > { %4637 = vmatmul.mubr.msk.f32.vlgmr.msra.gmra.mxu1 %vm2724_vm5, %v5747_v20  ;;  %4860 = vmatprep.subr.msk.mxu1 %vm748_vm4, %v5760_v30 }
 0x3e0   : > { %4868 = vmatpush3.msk.msra.mxu0 %vm748_vm4, %v3077_v27  ;;  %4861 = vmatpush3.msk.msra.mxu1 %vm748_vm4, %v5760_v30  ;;  %v5934_v26 = vpop.permute.xlu0 %4050 }
 0x3e1   : > { %4869 = vmatprep.subr.mxu0 %v3074_v24  ;;  %v5939_v17 = vpop.permute.xlu1 %4048  ;;  %4862 = vmatprep.subr.mxu1 %v5712_v15 }
 0x3e2   : > { %4870 = vmatpush3.msra.mxu0 %v3074_v24  ;;  %2807 = vmatprep.mubr.f32.mxu1 %v4968_v1 }
 0x3e3   : > { %4863 = vmatpush3.msra.mxu1 %v5712_v15  ;;  %4647 = vmatmul.mubr.msk.f32.gmra.mxu0 %vm2724_vm5, %v2691_v3 }
 0x3e4   : > { %4638 = vmatmul.mubr.msk.f32.gmra.mxu1 %vm2724_vm5, %v4634_v58  ;;  %v3267_v20 = vpop.permute.xlu0 %3266  ;;  %4871 = vmatprep.mubr.msk.f32.mxu0 %vm2724_vm5, %v4651_v29  ;;  %v3668_v58 = vsel %vm1844_vm9, %v5872_v55, %v5874_v56  ;;  %v3667_v56 = vsel %vm1844_vm9, %v5866_v62, %v5872_v55  ;;  %v3864_v55 = vsel %vm2043_vm10, %v5844_v42, %v5876_v57 }
 0x3e5   : > { %v3067_v30 = vpop.permute.xlu1 %3066  ;;  %4864 = vmatprep.mubr.msk.f32.mxu1 %vm2724_vm5, %v2690_v25  ;;  %v3275_v47 = vsel %vm1446_vm7, %v3267_v20, %v5835_v19 }
 0x3e6   : > { %v3075_v14 = vsel %vm1247_vm6, %v3065_v8, %v3067_v30  ;;  %v3076_v41 = vsel %vm1247_vm6, %v3067_v30, %v3069_v35  ;;  %v4697_v30 = vld [vmem:[%s6171_s9 + $0x78] sm:$0xf] }
 0x3e7   : > { %4653 = vmatprep.subr.msk.mxu1 %vm748_vm4, %v3076_v41  ;;  %4872 = vmatmul.mubr.msk.f32.vlgmr.msra.gmra.mxu0 %vm2724_vm5, %v4652_v32 }
 0x3e8   : > { %4865 = vmatmul.mubr.msk.f32.vlgmr.msra.gmra.mxu1 %vm2724_vm5, %v2691_v3  ;;  %v3465_v15 = vpop.permute.xlu0 %3464  ;;  %3355 = vmatprep.mubr.f32.mxu0 %v4968_v1 }
 0x3e9   : > { %4654 = vmatpush1.msk.msra.mxu1 %vm748_vm4, %v3075_v14  ;;  %v5961_v43 = vpop.permute.xlu1 %4052  ;;  %3157 = vmatprep.mubr.f32.mxu1 %v4968_v1  ;;  %v3473_v53 = vsel %vm1645_vm8, %v3465_v15, %v5842_v13  ;;  %v3470_v13 = vsel %vm1645_vm8, %v5862_v10, %v5864_v63  ;;  %v4670_v63 = vld [vmem:[%s6171_s9 + $0x48] sm:$0xf] }
 0x3ea   : > { %3123 = vmatprep.subr.mxu1 %v3073_v6 }
 0x3eb   : > { %3124 = vmatpush1.msra.mxu1 %v3072_v16 }
 0x3ec   : > { %4655 = vmatmul.mubr.msk.f32.vlgmr.msra.gmra.mxu1 %vm2724_vm5, %v4651_v29  ;;  %4874 = vmatprep.subr.msk.mxu1 %vm748_vm4, %v3275_v47  ;;  %v5974_v18 = vpop.permute.xlu0 %4046  ;;  %v4696_v29 = vld [vmem:[%s6171_s9 + $0x70] sm:$0xff] }
 0x3ed   : > { %4875 = vmatpush3.msk.msra.mxu1 %vm748_vm4, %v3275_v47  ;;  %v3265_v45 = vpop.permute.xlu1 %3264  ;;  %3163 = vmatprep.mubr.f32.mxu1 %v4968_v1  ;;  %v4706_v47 = vld [vmem:[%s6171_s9 + $0x88] sm:$0xf] }
 0x3ee   : > { %v3273_v37 = vsel %vm1446_vm7, %v5880_v22, %v3265_v45  ;;  %v3274_v19 = vsel %vm1446_vm7, %v3265_v45, %v3267_v20  ;;  %4876 = vmatprep.subr.mxu1 %v3272_v48  ;;  %v4661_v22 = vld [vmem:[%s6171_s9 + $0x38] sm:$0xf]  ;;  %v4063_v20 = vsel %vm2242_vm11, %v5939_v17, %v5934_v26 }
 0x3ef   : > { %4877 = vmatpush3.msra.mxu1 %v3272_v48  ;;  %4662 = vmatprep.subr.msk.mxu0 %vm748_vm4, %v3274_v19 }
 0x3f0   : > { %4656 = vmatmul.mubr.msk.f32.gmra.mxu1 %vm2724_vm5, %v4652_v32  ;;  %4663 = vmatpush1.msk.msra.mxu0 %vm748_vm4, %v3273_v37  ;;  %v3663_v11 = vpop.permute.xlu0 %3662  ;;  %v4062_v32 = vsel %vm2242_vm11, %v5974_v18, %v5939_v17 }
 0x3f1   : > { %v3463_v54 = vpop.permute.xlu1 %3462  ;;  %3321 = vmatprep.subr.mxu0 %v3271_v12  ;;  %4878 = vmatprep.mubr.msk.f32.mxu1 %vm2724_vm5, %v4660_v49  ;;  %v3671_v34 = vsel %vm1844_vm9, %v3663_v11, %v5846_v36 }
 0x3f2   : > { %v3471_v28 = vsel %vm1645_vm8, %v5885_v5, %v3463_v54  ;;  %v3472_v8 = vsel %vm1645_vm8, %v3463_v54, %v3465_v15  ;;  %3322 = vmatpush1.msra.mxu0 %v3270_v51  ;;  %v4669_v5 = vld [vmem:[%s6171_s9 + $0x40] sm:$0xff] }
 0x3f3   : > { %4664 = vmatmul.mubr.msk.f32.vlgmr.msra.gmra.mxu0 %vm2724_vm5, %v4660_v49  ;;  %4671 = vmatprep.subr.msk.mxu1 %vm748_vm4, %v3472_v8 }
 0x3f4   : > { %4879 = vmatmul.mubr.msk.f32.vlgmr.msra.gmra.mxu1 %vm2724_vm5, %v4661_v22  ;;  %4881 = vmatprep.subr.msk.mxu0 %vm748_vm4, %v3473_v53  ;;  %v3861_v21 = vpop.permute.xlu0 %3860 }
 0x3f5   : > { %4672 = vmatpush1.msk.msra.mxu1 %vm748_vm4, %v3471_v28  ;;  %4882 = vmatpush3.msk.msra.mxu0 %vm748_vm4, %v3473_v53  ;;  %v6011_v52 = vpop.permute.xlu1 %4252  ;;  %v3869_v9 = vsel %vm2043_vm10, %v3861_v21, %v5848_v46  ;;  %v3866_v46 = vsel %vm2043_vm10, %v5878_v60, %v5893_v4 }
 0x3f6   : > { %3519 = vmatprep.subr.mxu1 %v3469_v59  ;;  %4883 = vmatprep.subr.mxu0 %v3470_v13 }
 0x3f7   : > { %3361 = vmatprep.mubr.f32.mxu0 %v4968_v1  ;;  %3520 = vmatpush1.msra.mxu1 %v3468_v61 }
 0x3f8   : > { %3553 = vmatprep.mubr.f32.mxu1 %v4968_v1  ;;  %4884 = vmatpush3.msra.mxu0 %v3470_v13  ;;  %v6031_v44 = vpop.permute.xlu0 %4246 }
 0x3f9   : > { %4665 = vmatmul.mubr.msk.f32.gmra.mxu0 %vm2724_vm5, %v4661_v22  ;;  %4673 = vmatmul.mubr.msk.f32.vlgmr.msra.gmra.mxu1 %vm2724_vm5, %v4669_v5  ;;  %v3661_v7 = vpop.permute.xlu1 %3660 }
 0x3fa   : > { %4888 = vmatprep.subr.msk.mxu1 %vm748_vm4, %v3671_v34  ;;  %v3670_v10 = vsel %vm1844_vm9, %v3661_v7, %v3663_v11  ;;  %3559 = vmatprep.mubr.f32.mxu1 %v4968_v1  ;;  %v3669_v36 = vsel %vm1844_vm9, %v5882_v33, %v3661_v7 }
 0x3fb   : > { %4889 = vmatpush3.msk.msra.mxu1 %vm748_vm4, %v3671_v34  ;;  %4885 = vmatprep.mubr.msk.f32.mxu0 %vm2724_vm5, %v4669_v5 }
 0x3fc   : > { %4890 = vmatprep.subr.mxu1 %v3668_v58  ;;  %4680 = vmatprep.subr.msk.mxu0 %vm748_vm4, %v3670_v10  ;;  %v4059_v38 = vpop.permute.xlu0 %4058 }
 0x3fd   : > { %4891 = vmatpush3.msra.mxu1 %v3668_v58  ;;  %4886 = vmatmul.mubr.msk.f32.vlgmr.msra.gmra.mxu0 %vm2724_vm5, %v4670_v63  ;;  %v3859_v25 = vpop.permute.xlu1 %3858 }
 0x3fe   : > { %4674 = vmatmul.mubr.msk.f32.gmra.mxu1 %vm2724_vm5, %v4670_v63  ;;  %4681 = vmatpush1.msk.msra.mxu0 %vm748_vm4, %v3669_v36  ;;  %v3868_v33 = vsel %vm2043_vm10, %v3859_v25, %v3861_v21  ;;  %v3867_v35 = vsel %vm2043_vm10, %v5895_v2, %v3859_v25  ;;  %v4687_v2 = vld [vmem:[%s6171_s9 + $0x60] sm:$0xff] }
 0x3ff   : > { %3717 = vmatprep.subr.mxu0 %v3667_v56  ;;  %3751 = vmatprep.mubr.f32.mxu0 %v4968_v1 }
 0x400   : > { %3718 = vmatpush1.msra.mxu0 %v5870_v50  ;;  %4892 = vmatprep.mubr.msk.f32.mxu1 %vm2724_vm5, %v4678_v23  ;;  %v3865_v50 = vsel %vm2043_vm10, %v5876_v57, %v5878_v60  ;;  %v4257_v31 = vpop.permute.xlu0 %4256  ;;  %v4067_v60 = vsel %vm2242_vm11, %v4059_v38, %v5922_v40  ;;  %v4688_v57 = vld [vmem:[%s6171_s9 + $0x68] sm:$0xf]  ;;  %v4064_v40 = vsel %vm2242_vm11, %v5934_v26, %v5961_v43  ;;  %v4705_v43 = vld [vmem:[%s6171_s9 + $0x80] sm:$0xff] }
 0x401   : > { %4682 = vmatmul.mubr.msk.f32.vlgmr.msra.gmra.mxu0 %vm2724_vm5, %v4678_v23  ;;  %4689 = vmatprep.subr.msk.mxu1 %vm748_vm4, %v3868_v33  ;;  %v6069_v62 = vpop.permute.xlu1 %4248 }
 0x402   : > { %4893 = vmatmul.mubr.msk.f32.vlgmr.msra.gmra.mxu1 %vm2724_vm5, %v4679_v39  ;;  %4895 = vmatprep.subr.msk.mxu0 %vm748_vm4, %v3869_v9  ;;  %v4261_v15 = vsel %vm2441_vm12, %v6031_v44, %v6069_v62 }
 0x403   : > { %4690 = vmatpush1.msk.msra.mxu1 %vm748_vm4, %v3867_v35  ;;  %4896 = vmatpush3.msk.msra.mxu0 %vm748_vm4, %v3869_v9 }
 0x404   : > { %3915 = vmatprep.subr.mxu1 %v3865_v50  ;;  %4897 = vmatprep.subr.mxu0 %v3866_v46  ;;  %v4245_v3 = vpop.permute.xlu0 %4244 }
 0x405   : > { %3757 = vmatprep.mubr.f32.mxu0 %v4968_v1  ;;  %3916 = vmatpush1.msra.mxu1 %v3864_v55  ;;  %v4057_v27 = vpop.permute.xlu1 %4056  ;;  %v4260_v6 = vsel %vm2441_vm12, %v4245_v3, %v6031_v44 }
 0x406   : > { %3949 = vmatprep.mubr.f32.mxu1 %v4968_v1  ;;  %4898 = vmatpush3.msra.mxu0 %v3866_v46  ;;  %v4066_v42 = vsel %vm2242_vm11, %v4057_v27, %v4059_v38  ;;  %v4065_v4 = vsel %vm2242_vm11, %v5908_v0, %v4057_v27 }
 0x407   : > { %4683 = vmatmul.mubr.msk.f32.gmra.mxu0 %vm2724_vm5, %v4679_v39  ;;  %4691 = vmatmul.mubr.msk.f32.vlgmr.msra.gmra.mxu1 %vm2724_vm5, %v4687_v2 }
 0x408   : > { %4902 = vmatprep.subr.msk.mxu1 %vm748_vm4, %v4067_v60  ;;  %3955 = vmatprep.mubr.f32.mxu1 %v4968_v1  ;;  %v4251_v17 = vpop.permute.xlu0 %4250 }
 0x409   : > { %4903 = vmatpush3.msk.msra.mxu1 %vm748_vm4, %v4067_v60  ;;  %4899 = vmatprep.mubr.msk.f32.mxu0 %vm2724_vm5, %v4687_v2  ;;  %v4255_v24 = vpop.permute.xlu1 %4254  ;;  %v4262_v16 = vsel %vm2441_vm12, %v6069_v62, %v4251_v17 }
 0x40a   : > { %4904 = vmatprep.subr.mxu1 %v4064_v40  ;;  %4698 = vmatprep.subr.msk.mxu0 %vm748_vm4, %v4066_v42  ;;  %v4264_v0 = vsel %vm2441_vm12, %v4255_v24, %v4257_v31  ;;  %v4263_v41 = vsel %vm2441_vm12, %v6011_v52, %v4255_v24 }
 0x40b   : > { %4905 = vmatpush3.msra.mxu1 %v4064_v40  ;;  %4900 = vmatmul.mubr.msk.f32.vlgmr.msra.gmra.mxu0 %vm2724_vm5, %v4688_v57 }
 0x40c   : > { %4692 = vmatmul.mubr.msk.f32.gmra.mxu1 %vm2724_vm5, %v4688_v57  ;;  %4699 = vmatpush1.msk.msra.mxu0 %vm748_vm4, %v4065_v4 }
 0x40d   : > { %4113 = vmatprep.subr.mxu0 %v4063_v20  ;;  %4147 = vmatprep.mubr.f32.mxu0 %v4968_v1  ;;  %v4259_v14 = vpop.permute.xlu1 %4258 }
 0x40e   : > { %4114 = vmatpush1.msra.mxu0 %v4062_v32  ;;  %4906 = vmatprep.mubr.msk.f32.mxu1 %vm2724_vm5, %v4696_v29  ;;  %v4265_v26 = vsel %vm2441_vm12, %v4257_v31, %v4259_v14 }
 0x40f   : > { %4700 = vmatmul.mubr.msk.f32.vlgmr.msra.gmra.mxu0 %vm2724_vm5, %v4696_v29  ;;  %4707 = vmatprep.subr.msk.mxu1 %vm748_vm4, %v4264_v0 }
 0x410   : > { %4907 = vmatmul.mubr.msk.f32.vlgmr.msra.gmra.mxu1 %vm2724_vm5, %v4697_v30  ;;  %4153 = vmatprep.mubr.f32.mxu0 %v4968_v1 }
 0x411   : > { %4708 = vmatpush1.msk.msra.mxu1 %vm748_vm4, %v4263_v41  ;;  %4345 = vmatprep.mubr.f32.mxu1 %v4968_v1 }
 0x412   : > { %4311 = vmatprep.subr.mxu1 %v4261_v15  ;;  %4909 = vmatprep.subr.msk.mxu0 %vm748_vm4, %v4265_v26 }
 0x413   : > { %4312 = vmatpush1.msra.mxu1 %v4260_v6  ;;  %4701 = vmatmul.mubr.msk.f32.gmra.mxu0 %vm2724_vm5, %v4697_v30 }
 0x414   : > { %4709 = vmatmul.mubr.msk.f32.vlgmr.msra.gmra.mxu1 %vm2724_vm5, %v4705_v43  ;;  %4910 = vmatpush3.msk.msra.mxu0 %vm748_vm4, %v4265_v26 }
 0x415   : > { %4911 = vmatprep.subr.mxu0 %v4262_v16  ;;  %4351 = vmatprep.mubr.f32.mxu1 %v4968_v1 }
 0x416   : > { %4912 = vmatpush3.msra.mxu0 %v4262_v16  ;;  %4913 = vmatprep.mubr.msk.f32.mxu0 %vm2724_vm5, %v4705_v43 }
 0x417   : > { %4914 = vmatmul.mubr.msk.f32.vlgmr.msra.gmra.mxu0 %vm2724_vm5, %v4706_v47 }
 0x418   : > { %4710 = vmatmul.mubr.msk.f32.gmra.mxu1 %vm2724_vm5, %v4706_v47 }
 0x496   : > { %v4859_v18 = vpop.f32.mrf.mxu0 }
 0x498   : > { %v2880_v45 = vpop.f32.mrf.mxu0 }
 0x49a   : > { %v2967_v37 = vpop.f32.mrf.mxu0 }
 0x49c   : > { %v2969_v49 = vpop.f32.mrf.mxu0 }
 0x49f   : > { %v2803_v48 = vpop.f32.mrf.mxu1 }
 0x4a0   : > { %v2968_v35 = vadd.f32 %v2967_v37, %v2803_v48 }
 0x4a1   : > { %v2805_v19 = vpop.f32.mrf.mxu1 }
 0x4a2   : > { %v2970_v46 = vadd.f32 %v2969_v49, %v2805_v19 }
 0x4a3   : > { %v2973_v51 = vpop.f32.mrf.mxu0 }
 0x4a4   : > { %v2809_v11 = vpop.f32.mrf.mxu1 }
 0x4a5   : > { %v2975_v28 = vpop.f32.mrf.mxu0  ;;  %v2974_v60 = vadd.f32 %v2973_v51, %v2809_v11 }
 0x4a6   : > { %v2811_v12 = vpop.f32.mrf.mxu1 }
 0x4a7   : > { %v4873_v8 = vpop.f32.mrf.mxu0  ;;  %v2976_v3 = vadd.f32 %v2975_v28, %v2811_v12 }
 0x4a8   : > { %v4866_v54 = vpop.f32.mrf.mxu1 }
 0x4a9   : > { %v3236_v52 = vpop.f32.mrf.mxu0  ;;  %v3050_v50 = vadd.f32 %v4866_v54, %v4859_v18 }
 0x4aa   : > { %v3044_v22 = vpop.f32.mrf.mxu1 }
 0x4ab   : > { %v3045_v27 = vadd.f32 %v3044_v22, %v2880_v45  ;;  %v3250_v40 = vadd.f32 %v4873_v8, %v3050_v50 }
 0x4ac   : > { %v3159_v1 = vpop.f32.mrf.mxu1 }
 0x4ad   : > { %v3245_v55 = vadd.f32 %v3159_v1, %v2968_v35  ;;  %v3247_v30 = vadd.f32 %v3236_v52, %v3045_v27  ;;  %v4449_v35 = vpop.permute.xlu0 %4448 }
 0x4ae   : > { %v3161_v53 = vpop.f32.mrf.mxu1 }
 0x4af   : > { %v3246_v42 = vadd.f32 %v3161_v53, %v2970_v46 }
 0x4b0   : > { %v3165_v21 = vpop.f32.mrf.mxu1 }
 0x4b1   : > { %v3248_v29 = vadd.f32 %v3165_v21, %v2974_v60 }
 0x4b2   : > { %v3167_v59 = vpop.f32.mrf.mxu1 }
 0x4b3   : > { %v3357_v13 = vpop.f32.mrf.mxu0  ;;  %v3249_v26 = vadd.f32 %v3167_v59, %v2976_v3 }
 0x4b4   : > { %v4880_v61 = vpop.f32.mrf.mxu1  ;;  %v3443_v57 = vadd.f32 %v3357_v13, %v3245_v55 }
 0x4b5   : > { %v3359_v5 = vpop.f32.mrf.mxu0  ;;  %v3448_v14 = vadd.f32 %v4880_v61, %v3250_v40 }
 0x4b6   : > { %v3434_v34 = vpop.f32.mrf.mxu1  ;;  %v3444_v0 = vadd.f32 %v3359_v5, %v3246_v42 }
 0x4b7   : > { %v3445_v16 = vadd.f32 %v3434_v34, %v3247_v30 }
 0x4b9   : > { %v3363_v44 = vpop.f32.mrf.mxu0  ;;  %v3555_v7 = vpop.f32.mrf.mxu1 }
 0x4ba   : > { %v3641_v20 = vadd.f32 %v3555_v7, %v3443_v57  ;;  %v3446_v17 = vadd.f32 %v3363_v44, %v3248_v29  ;;  %v4444_v44 = vpop.permute.xlu1 %4443 }
 0x4bb   : > { %v3365_v10 = vpop.f32.mrf.mxu0  ;;  %v3557_v63 = vpop.f32.mrf.mxu1 }
 0x4bc   : > { %v3642_v15 = vadd.f32 %v3557_v63, %v3444_v0  ;;  %v3447_v45 = vadd.f32 %v3365_v10, %v3249_v26 }
 0x4bd   : > { %v4887_v36 = vpop.f32.mrf.mxu0 }
 0x4be   : > { %v3561_v58 = vpop.f32.mrf.mxu1  ;;  %v3646_v47 = vadd.f32 %v4887_v36, %v3448_v14 }
 0x4bf   : > { %v3632_v25 = vpop.f32.mrf.mxu0  ;;  %v3644_v48 = vadd.f32 %v3561_v58, %v3446_v17 }
 0x4c0   : > { %v3563_v23 = vpop.f32.mrf.mxu1  ;;  %v3643_v11 = vadd.f32 %v3632_v25, %v3445_v16 }
 0x4c1   : > { %v3753_v33 = vpop.f32.mrf.mxu0  ;;  %v3645_v54 = vadd.f32 %v3563_v23, %v3447_v45 }
 0x4c2   : > { %v4894_v56 = vpop.f32.mrf.mxu1  ;;  %v3839_v43 = vadd.f32 %v3753_v33, %v3641_v20 }
 0x4c3   : > { %v3755_v38 = vpop.f32.mrf.mxu0  ;;  %v3844_v12 = vadd.f32 %v4894_v56, %v3646_v47 }
 0x4c4   : > { %v3830_v39 = vpop.f32.mrf.mxu1  ;;  %v3840_v37 = vadd.f32 %v3755_v38, %v3642_v15 }
 0x4c5   : > { %v3841_v53 = vadd.f32 %v3830_v39, %v3643_v11 }
 0x4c7   : > { %v3759_v9 = vpop.f32.mrf.mxu0  ;;  %v3951_v62 = vpop.f32.mrf.mxu1 }
 0x4c8   : > { %v4037_v19 = vadd.f32 %v3951_v62, %v3839_v43  ;;  %v3842_v22 = vadd.f32 %v3759_v9, %v3644_v48 }
 0x4c9   : > { %v3761_v2 = vpop.f32.mrf.mxu0  ;;  %v3953_v31 = vpop.f32.mrf.mxu1 }
 0x4ca   : > { %v4038_v28 = vadd.f32 %v3953_v31, %v3840_v37  ;;  %v3843_v59 = vadd.f32 %v3761_v2, %v3645_v54 }
 0x4cb   : > { %v4901_v4 = vpop.f32.mrf.mxu0 }
 0x4cc   : > { %v3957_v24 = vpop.f32.mrf.mxu1  ;;  %v4042_v21 = vadd.f32 %v4901_v4, %v3844_v12 }
 0x4cd   : > { %v4028_v32 = vpop.f32.mrf.mxu0  ;;  %v4040_v13 = vadd.f32 %v3957_v24, %v3842_v22 }
 0x4ce   : > { %v3959_v41 = vpop.f32.mrf.mxu1  ;;  %v4039_v7 = vadd.f32 %v4028_v32, %v3841_v53 }
 0x4cf   : > { %v4149_v6 = vpop.f32.mrf.mxu0  ;;  %v4041_v36 = vadd.f32 %v3959_v41, %v3843_v59 }
 0x4d0   : > { %v4908_v18 = vpop.f32.mrf.mxu1  ;;  %v4235_v1 = vadd.f32 %v4149_v6, %v4037_v19 }
 0x4d1   : > { %v4151_v49 = vpop.f32.mrf.mxu0  ;;  %v4240_v10 = vadd.f32 %v4908_v18, %v4042_v21 }
 0x4d2   : > { %v4226_v51 = vpop.f32.mrf.mxu1  ;;  %v4236_v61 = vadd.f32 %v4151_v49, %v4038_v28 }
 0x4d3   : > { %v4155_v8 = vpop.f32.mrf.mxu0  ;;  %v4237_v56 = vadd.f32 %v4226_v51, %v4039_v7 }
 0x4d4   : > { %v4347_v52 = vpop.f32.mrf.mxu1  ;;  %v4238_v58 = vadd.f32 %v4155_v8, %v4040_v13 }
 0x4d5   : > { %v4433_v5 = vadd.f32 %v4347_v52, %v4235_v1  ;;  %v4157_v34 = vpop.f32.mrf.mxu0 }
 0x4d6   : > { %v4349_v63 = vpop.f32.mrf.mxu1  ;;  %v4239_v62 = vadd.f32 %v4157_v34, %v4041_v36 }
 0x4d7   : > { %v4451_v25 = vadd.f32 %v4444_v44, %v4433_v5  ;;  %v4434_v23 = vadd.f32 %v4349_v63, %v4236_v61  ;;  %v4915_v33 = vpop.f32.mrf.mxu0 }
 0x4d8   : > { %v4353_v38 = vpop.f32.mrf.mxu1  ;;  %v4438_v39 = vadd.f32 %v4915_v33, %v4240_v10 }
 0x4d9   : > { %v4457_v9 = vmax.f32 %v4451_v25, 0.0  ;;  %v4452_v50 = vadd.f32 %v4444_v44, %v4434_v23  ;;  %v4436_v46 = vadd.f32 %v4353_v38, %v4238_v58  ;;  %v4424_v55 = vpop.f32.mrf.mxu0 }
 0x4da   : > { %v4456_v2 = vadd.f32 %v4449_v35, %v4438_v39  ;;  %v4355_v31 = vpop.f32.mrf.mxu1  ;;  %v4435_v27 = vadd.f32 %v4424_v55, %v4237_v56 }
 0x4db   : > { %4463 = vst [vmem:[%s408_s20] sm:$0xff] %v4457_v9  ;;  %v4458_v60 = vmax.f32 %v4452_v50, 0.0  ;;  %v4454_v42 = vadd.f32 %v4449_v35, %v4436_v46  ;;  %v4437_v57 = vadd.f32 %v4355_v31, %v4239_v62 }
 0x4dc   : > { %v4462_v4 = vmax.f32 %v4456_v2, 0.0  ;;  %v4453_v40 = vadd.f32 %v4444_v44, %v4435_v27 }
 0x4dd   : > { %4464 = vst [vmem:[%s408_s20 + $0x8] sm:$0xff] %v4458_v60  ;;  %v4460_v24 = vmax.f32 %v4454_v42, 0.0  ;;  %v4455_v3 = vadd.f32 %v4449_v35, %v4437_v57 }
 0x4de   : > { %4468 = vst [vmem:[%s408_s20 + $0x28] sm:$0xf] %v4462_v4  ;;  %v4459_v29 = vmax.f32 %v4453_v40, 0.0 }
 0x4df   : > { %4466 = vst [vmem:[%s408_s20 + $0x18] sm:$0xf] %v4460_v24  ;;  %v4461_v0 = vmax.f32 %v4455_v3, 0.0 }
 0x4e0   : > { %4465 = vst [vmem:[%s408_s20 + $0x10] sm:$0xff] %v4459_v29 }
 0x4e1   : > { %4467 = vst [vmem:[%s408_s20 + $0x20] sm:$0xf] %v4461_v0 }
 0x4e2 PF: > { %s23_s19 = sadd.s32 1, %s4966_s19  }
 0x4e3   : > { %p20_p4 = scmp.ge.s32.totalorder %s23_s19, 4  }
 0x4e5   :  { %22 = sbr.rel (!%p20_p4) target bundleno = 3 (0x3), region = 113 }

</bundles_post_ra>
